<compile_context>
chip_gen: v5e
topology: v5e:2x2
jax: 0.10.0
libtpu: 0.0.40
codegen_flags: <defaults>
</compile_context>

<pallas_src>
import jax
import jax.numpy as jnp
from jax.experimental import pallas as pl
from jax.experimental.pallas import tpu as pltpu

LANE = 128
SUBLANE = 8


def _round_up(x, m):
    return ((x + m - 1) // m) * m


def _multitask_kernel(xp_ref, wconv_ref, bconv_ref, wfc_ref, bfc_ref, out_ref):
    # xp_ref:    [TB*HW, Kp]  bf16 im2col patches (K zero-padded to lane width)
    # wconv_ref: [Kp, Cfp]    bf16 flattened 3x3 conv weight (zero-padded)
    # bconv_ref: [1, Cfp]     f32 conv bias (zero-padded)
    # wfc_ref:   [Cfp, Tp]    bf16 fc weight, pre-scaled by 1/HW, zero-padded
    # bfc_ref:   [1, Tp]      f32 fc bias (zero-padded)
    # out_ref:   [TB, Tp]     f32 logits — one full dense (8,128) tile store
    tb = out_ref.shape[0]
    rows = xp_ref.shape[0]
    hw = rows // tb
    cfp = wconv_ref.shape[1]

    # One consolidated conv matmul for the whole batch block (bf16 MXU, f32 acc).
    conv = jnp.dot(xp_ref[...], wconv_ref[...],
                   preferred_element_type=jnp.float32)             # [TB*HW, Cfp]
    act = jnp.maximum(conv + bconv_ref[...], 0.0)                  # bias + ReLU (f32 VPU)

    # Global average pool: f32 sublane-sum on the XLU; the 1/HW mean scale is
    # folded into wfc in the wrapper (exact — HW is a power of two here).
    pooled = jnp.sum(act.reshape(tb, hw, cfp), axis=1)             # [TB, Cfp] f32

    # Batched FC over the lane-padded class dimension (bf16 MXU, f32 acc).
    logits = jnp.dot(pooled.astype(wfc_ref.dtype), wfc_ref[...],
                     preferred_element_type=jnp.float32) + bfc_ref[...]   # [TB, Tp]

    out_ref[...] = logits                                          # unmasked full-tile store


def simple_multitask_forward(x_nchw, params, classes_per_taxon,
                             matmul_dtype=jnp.bfloat16, batch_block=8):
    """Pallas forward. x_nchw: [B, Cin, H, W] float32 (PyTorch layout)."""
    wconv, bconv, wfc, bfc = params
    B, Cin, H, W = x_nchw.shape
    Cf = wconv.shape[-1]
    total = wfc.shape[1]
    HW = H * W
    K = 9 * Cin

    # Padded sizes: lane-dense contraction / feature / class dims, sublane-dense batch.
    Kp = _round_up(K, LANE)
    Cfp = _round_up(Cf, LANE)
    Tp = _round_up(total, LANE)
    TB = _round_up(max(batch_block, 1), SUBLANE)
    Bp = _round_up(B, TB)
    nblocks = Bp // TB

    # --- im2col in the wrapper (conv padding folded in; fuses inside the jit) ---
    x = jnp.transpose(x_nchw, (0, 2, 3, 1))                         # NCHW -> NHWC
    xpad = jnp.pad(x, ((0, 0), (1, 1), (1, 1), (0, 0)))             # conv pad = 1
    taps = [xpad[:, di:di + H, dj:dj + W, :]                        # tap (di, dj)
            for di in range(3) for dj in range(3)]
    patches = jnp.stack(taps, axis=3).reshape(B, HW, K)             # [B, HW, 9*Cin]
    patches = jnp.pad(patches, ((0, Bp - B), (0, 0), (0, Kp - K)))  # batch + K padding
    patches2d = patches.reshape(Bp * HW, Kp).astype(matmul_dtype)   # [Bp*HW, Kp]

    wconv_flat = jnp.pad(wconv.reshape(K, Cf),
                         ((0, Kp - K), (0, Cfp - Cf))).astype(matmul_dtype)
    bconv_p = jnp.pad(bconv.astype(jnp.float32).reshape(1, Cf),
                      ((0, 0), (0, Cfp - Cf)))
    # Fold the 1/HW pooling scale into the fc weight (exact: HW is a power of two).
    wfc_p = jnp.pad(wfc.astype(jnp.float32) * (1.0 / HW),
                    ((0, Cfp - Cf), (0, Tp - total))).astype(matmul_dtype)
    bfc_p = jnp.pad(bfc.astype(jnp.float32).reshape(1, total),
                    ((0, 0), (0, Tp - total)))

    out = pl.pallas_call(
        _multitask_kernel,
        out_shape=jax.ShapeDtypeStruct((Bp, Tp), jnp.float32),
        grid_spec=pltpu.PrefetchScalarGridSpec(
            num_scalar_prefetch=0,
            grid=(nblocks,),
            in_specs=[
                pl.BlockSpec((TB * HW, Kp), lambda i: (i, 0)),   # per-block patches
                pl.BlockSpec((Kp, Cfp),     lambda i: (0, 0)),   # conv weight (resident)
                pl.BlockSpec((1, Cfp),      lambda i: (0, 0)),   # conv bias
                pl.BlockSpec((Cfp, Tp),     lambda i: (0, 0)),   # fc weight (scaled, padded)
                pl.BlockSpec((1, Tp),       lambda i: (0, 0)),   # fc bias (padded)
            ],
            out_specs=pl.BlockSpec((TB, Tp), lambda i: (i, 0)),
        ),
        compiler_params=pltpu.CompilerParams(
            dimension_semantics=("parallel",),   # batch-block split across TCs on v7x
        ),
    )(patches2d, wconv_flat, bconv_p, wfc_p, bfc_p)

    logits = out[:B, :total]                                        # drop batch/lane padding

    # Per-taxon split (glue, mirrors the PyTorch loop over classes_per_taxon).
    outs, i = [], 0
    for c in classes_per_taxon:
        outs.append(logits[:, i:i + c])
        i += c
    return outs


def reference_forward(x_nchw, params, classes_per_taxon,
                      matmul_dtype=jnp.float32):
    """Pure-JAX reference with the same math (matmul operands in matmul_dtype,
    f32 accumulation) for a correctness check."""
    wconv, bconv, wfc, bfc = params
    x = jnp.transpose(x_nchw, (0, 2, 3, 1))
    xp = jnp.pad(x, ((0, 0), (1, 1), (1, 1), (0, 0)))
    B, Hp, Wp, Cin = xp.shape
    H, W = Hp - 2, Wp - 2
    Cf = wconv.shape[-1]
    acc = jnp.zeros((B, H, W, Cf), jnp.float32)
    for t in range(9):
        di, dj = t // 3, t % 3
        acc = acc + jnp.einsum(
            "bhwc,cf->bhwf",
            xp[:, di:di + H, dj:dj + W, :].astype(matmul_dtype),
            wconv[t].astype(matmul_dtype),
            preferred_element_type=jnp.float32)
    act = jnp.maximum(acc + bconv.reshape(1, 1, 1, Cf), 0.0)
    pooled = jnp.mean(act, axis=(1, 2))
    logits = jnp.dot(pooled.astype(matmul_dtype), wfc.astype(matmul_dtype),
                     preferred_element_type=jnp.float32) + bfc
    outs, i = [], 0
    for c in classes_per_taxon:
        outs.append(logits[:, i:i + c])
        i += c
    return outs


def init_params(key, cin, cfeat, total_classes):
    k1, k2, k3, k4 = jax.random.split(key, 4)
    wconv = 0.1 * jax.random.normal(k1, (9, cin, cfeat), jnp.float32)
    bconv = 0.1 * jax.random.normal(k2, (1, cfeat), jnp.float32)
    wfc = 0.1 * jax.random.normal(k3, (cfeat, total_classes), jnp.float32)
    bfc = 0.1 * jax.random.normal(k4, (1, total_classes), jnp.float32)
    return wconv, bconv, wfc, bfc


if __name__ == "__main__":
    B, Cin, H, W = 2, 4, 16, 16
    Cfeat = 32                       # backbone's fc.in_features
    classes_per_taxon = (3, 5, 2)    # total = 10 classes
    total_classes = sum(classes_per_taxon)

    key = jax.random.PRNGKey(0)
    kx, kp = jax.random.split(key)
    x = jax.random.normal(kx, (B, Cin, H, W), jnp.float32)   # NCHW input
    params = init_params(kp, Cin, Cfeat, total_classes)

    fwd = jax.jit(lambda xx, pp: simple_multitask_forward(xx, pp, classes_per_taxon))
    outs = jax.block_until_ready(fwd(x, params))

    # Check against a dtype-matched reference (bf16 matmul operands, f32 acc)
    # and, loosely, against the pure-f32 reference.
    refs_bf16 = reference_forward(x, params, classes_per_taxon, jnp.bfloat16)
    refs_f32 = reference_forward(x, params, classes_per_taxon, jnp.float32)
    for o, rb, rf, c in zip(outs, refs_bf16, refs_f32, classes_per_taxon):
        assert o.shape == (B, c), (o.shape, c)
        assert jnp.allclose(o, rb, atol=5e-3, rtol=5e-3), "mismatch vs bf16 reference"
        assert jnp.allclose(o, rf, atol=5e-2, rtol=5e-2), "mismatch vs f32 reference"

    print("KERNEL_OK")
</pallas_src>

<mosaic_0001>
module attributes {stable_mosaic.version = 11 : i64} {
  func.func @_multitask_kernel(%arg0: i32, %arg1: memref<2048x128xbf16, #tpu.memory_space<vmem>>, %arg2: memref<128x128xbf16, #tpu.memory_space<vmem>>, %arg3: memref<1x128xf32, #tpu.memory_space<vmem>>, %arg4: memref<128x128xbf16, #tpu.memory_space<vmem>>, %arg5: memref<1x128xf32, #tpu.memory_space<vmem>>, %arg6: memref<8x128xf32, #tpu.memory_space<vmem>>) attributes {dimension_semantics = [#tpu.dimension_semantics<parallel>], iteration_bounds = array<i64: 1>, scalar_prefetch = 0 : i64, scratch_operands = 0 : i64, tpu.core_type = #tpu.core_type<tc>, window_params = [{transform_indices = @transform_0, window_bounds = array<i64: 2048, 128>}, {pipeline_mode = #tpu.pipeline_mode<synchronous>, transform_indices = @transform_1, window_bounds = array<i64: 128, 128>}, {pipeline_mode = #tpu.pipeline_mode<synchronous>, transform_indices = @transform_2, window_bounds = array<i64: 1, 128>}, {pipeline_mode = #tpu.pipeline_mode<synchronous>, transform_indices = @transform_3, window_bounds = array<i64: 128, 128>}, {pipeline_mode = #tpu.pipeline_mode<synchronous>, transform_indices = @transform_4, window_bounds = array<i64: 1, 128>}, {transform_indices = @transform_5, window_bounds = array<i64: 8, 128>}]} {
    %c0 = arith.constant 0 : index
    %c0_0 = arith.constant 0 : index
    %0 = vector.load %arg1[%c0, %c0_0] : memref<2048x128xbf16, #tpu.memory_space<vmem>>, vector<2048x128xbf16>
    %c0_1 = arith.constant 0 : index
    %c0_2 = arith.constant 0 : index
    %1 = vector.load %arg2[%c0_1, %c0_2] : memref<128x128xbf16, #tpu.memory_space<vmem>>, vector<128x128xbf16>
    %cst = arith.constant dense<0.000000e+00> : vector<2048x128xf32>
    %2 = tpu.matmul %0, %1, %cst {dimension_numbers = #tpu.dot_dimension_numbers<[1], [0], [0], [1], [0, 0, 1, 1], [], []>} : vector<2048x128xbf16>, vector<128x128xbf16>, vector<2048x128xf32> -> vector<2048x128xf32>
    %c0_3 = arith.constant 0 : index
    %c0_4 = arith.constant 0 : index
    %3 = vector.load %arg3[%c0_3, %c0_4] : memref<1x128xf32, #tpu.memory_space<vmem>>, vector<1x128xf32>
    %4 = vector.broadcast %3 : vector<1x128xf32> to vector<2048x128xf32>
    %5 = arith.addf %2, %4 : vector<2048x128xf32>
    %cst_5 = arith.constant 0.000000e+00 : f32
    %6 = vector.broadcast %cst_5 : f32 to vector<2048x128xf32>
    %7 = arith.maximumf %5, %6 : vector<2048x128xf32>
    %8 = vector.shape_cast %7 : vector<2048x128xf32> to vector<8x256x128xf32>
    %cst_6 = arith.constant dense<0.000000e+00> : vector<8x128xf32>
    %9 = vector.multi_reduction <add>, %8, %cst_6 [1] : vector<8x256x128xf32> to vector<8x128xf32>
    %10 = arith.truncf %9 : vector<8x128xf32> to vector<8x128xbf16>
    %c0_7 = arith.constant 0 : index
    %c0_8 = arith.constant 0 : index
    %11 = vector.load %arg4[%c0_7, %c0_8] : memref<128x128xbf16, #tpu.memory_space<vmem>>, vector<128x128xbf16>
    %cst_9 = arith.constant dense<0.000000e+00> : vector<8x128xf32>
    %12 = tpu.matmul %10, %11, %cst_9 {dimension_numbers = #tpu.dot_dimension_numbers<[1], [0], [0], [1], [0, 0, 1, 1], [], []>} : vector<8x128xbf16>, vector<128x128xbf16>, vector<8x128xf32> -> vector<8x128xf32>
    %c0_10 = arith.constant 0 : index
    %c0_11 = arith.constant 0 : index
    %13 = vector.load %arg5[%c0_10, %c0_11] : memref<1x128xf32, #tpu.memory_space<vmem>>, vector<1x128xf32>
    %14 = vector.broadcast %13 : vector<1x128xf32> to vector<8x128xf32>
    %15 = arith.addf %12, %14 : vector<8x128xf32>
    %c0_12 = arith.constant 0 : index
    %c0_13 = arith.constant 0 : index
    %16 = vector.load %arg6[%c0_12, %c0_13] : memref<8x128xf32, #tpu.memory_space<vmem>>, vector<8x128xf32>
    tpu.vector_store %arg6[%c0_12, %c0_13], %15 {strides = array<i32>} : memref<8x128xf32, #tpu.memory_space<vmem>>, vector<8x128xf32>,
    return
  }
  func.func @transform_0(%arg0: i32) -> (i32, i32) {
    %c0_i32 = arith.constant 0 : i32
    %c0_i32_0 = arith.constant 0 : i32
    return %arg0, %c0_i32 : i32, i32
  }
  func.func @transform_1(%arg0: i32) -> (i32, i32) {
    %c0_i32 = arith.constant 0 : i32
    %c0_i32_0 = arith.constant 0 : i32
    %c0_i32_1 = arith.constant 0 : i32
    return %c0_i32, %c0_i32_0 : i32, i32
  }
  func.func @transform_2(%arg0: i32) -> (i32, i32) {
    %c0_i32 = arith.constant 0 : i32
    %c0_i32_0 = arith.constant 0 : i32
    %c0_i32_1 = arith.constant 0 : i32
    return %c0_i32, %c0_i32_0 : i32, i32
  }
  func.func @transform_3(%arg0: i32) -> (i32, i32) {
    %c0_i32 = arith.constant 0 : i32
    %c0_i32_0 = arith.constant 0 : i32
    %c0_i32_1 = arith.constant 0 : i32
    return %c0_i32, %c0_i32_0 : i32, i32
  }
  func.func @transform_4(%arg0: i32) -> (i32, i32) {
    %c0_i32 = arith.constant 0 : i32
    %c0_i32_0 = arith.constant 0 : i32
    %c0_i32_1 = arith.constant 0 : i32
    return %c0_i32, %c0_i32_0 : i32, i32
  }
  func.func @transform_5(%arg0: i32) -> (i32, i32) {
    %c0_i32 = arith.constant 0 : i32
    %c0_i32_0 = arith.constant 0 : i32
    return %arg0, %c0_i32 : i32, i32
  }
}

</mosaic_0001>

<bundles_post_ra>
// kernel: _lambda_.1
= control target key start
LH: loop header
LB: loop body
LE: loop exit
PB: predicated region body
PF: predicated region fallthrough
CT: control target
= control target key end

     0   :  { %vm2357_vm0 = vcmask 1041409   ;;  %vm2359_vm1 = vcmask 1042434   ;;  %vm2361_vm2 = vcmask 1043459   ;;  %vm2363_vm3 = vcmask 1044484   ;;  %s4038_s1 = inlined_call_operand.vmem [shape: bf16[128,128], index: 1, kind: input, shape index: {}]   ;;  %s4039_s2 = inlined_call_operand.vmem [shape: f32[1,128], index: 2, kind: input, shape index: {}]   ;;  %s4040_s0 = inlined_call_operand.vmem [shape: bf16[2048,128], index: 0, kind: input, shape index: {}]   ;;  %s4041_s3 = inlined_call_operand.vmem [shape: bf16[128,128], index: 3, kind: input, shape index: {}]   ;;  %s4042_s4 = inlined_call_operand.vmem [shape: f32[1,128], index: 4, kind: input, shape index: {}]   ;;  %s4043_s5 = inlined_call_operand.vmem [shape: f32[8,128], index: 5, kind: output, shape index: {}]  }
   0x1   :  { %v3150_v0 = vld [vmem:[%s4038_s1 + $0x38] sm:$0xff]  ;;  %v3149_v1 = vld [vmem:[%s4038_s1 + $0x30] sm:$0xff]  ;;  %v3148_v2 = vld [vmem:[%s4038_s1 + $0x28] sm:$0xff]  ;;  %vm2365_vm4 = vcmask 1045509   ;;  %vm2367_vm5 = vcmask 1046534   ;;  %vm2369_vm6 = vcmask 1047559  }
   0x2   :  { %1112 = vmatpush.bf16.msra.mxu0 %v3150_v0  ;;  %3159 = vmatpush.bf16.msra.mxu1 %v3150_v0  ;;  %v3147_v3 = vld [vmem:[%s4038_s1 + $0x20] sm:$0xff]  ;;  %v3146_v4 = vld [vmem:[%s4038_s1 + $0x18] sm:$0xff]  ;;  %v3145_v5 = vld [vmem:[%s4038_s1 + $0x10] sm:$0xff] }
   0x3   :  { %3160 = vmatpush.bf16.msra.mxu2 %v3150_v0  ;;  %3161 = vmatpush.bf16.msra.mxu3 %v3150_v0  ;;  %v3144_v6 = vld [vmem:[%s4038_s1 + $0x8] sm:$0xff]  ;;  %v3143_v7 = vld [vmem:[%s4038_s1] sm:$0xff]  ;;  %v3077_v10 = vld [vmem:[%s4040_s0 + $0x1f0] sm:$0xff] }
   0x4   :  { %v3015_v8 = vld [vmem:[%s4040_s0] sm:$0xff]  ;;  %v3110_v11 = vld [vmem:[%s4040_s0 + $0x2f8] sm:$0xff]  ;;  %v3016_v12 = vld [vmem:[%s4040_s0 + $0x8] sm:$0xff] }
   0x5   :  { %v3047_v9 = vld [vmem:[%s4040_s0 + $0x100] sm:$0xff]  ;;  %v3048_v13 = vld [vmem:[%s4040_s0 + $0x108] sm:$0xff]  ;;  %v3078_v14 = vld [vmem:[%s4040_s0 + $0x1f8] sm:$0xff] }
   0x6   :  { %1113 = vmatpush.bf16.msra.mxu0 %v3149_v1  ;;  %3162 = vmatpush.bf16.msra.mxu1 %v3149_v1  ;;  %v3111_v15 = vld [vmem:[%s4040_s0 + $0x300] sm:$0xff]  ;;  %v3017_v16 = vld [vmem:[%s4040_s0 + $0x10] sm:$0xff]  ;;  %v3112_v19 = vld [vmem:[%s4040_s0 + $0x308] sm:$0xff] }
   0x7   :  { %3163 = vmatpush.bf16.msra.mxu2 %v3149_v1  ;;  %3164 = vmatpush.bf16.msra.mxu3 %v3149_v1  ;;  %v3049_v17 = vld [vmem:[%s4040_s0 + $0x110] sm:$0xff]  ;;  %v3079_v18 = vld [vmem:[%s4040_s0 + $0x200] sm:$0xff]  ;;  %v3018_v20 = vld [vmem:[%s4040_s0 + $0x18] sm:$0xff] }
   0x8   :  { %v3050_v21 = vld [vmem:[%s4040_s0 + $0x118] sm:$0xff]  ;;  %v3080_v22 = vld [vmem:[%s4040_s0 + $0x208] sm:$0xff]  ;;  %v3113_v23 = vld [vmem:[%s4040_s0 + $0x310] sm:$0xff] }
   0x9   :  { %v3019_v24 = vld [vmem:[%s4040_s0 + $0x20] sm:$0xff]  ;;  %v3081_v26 = vld [vmem:[%s4040_s0 + $0x210] sm:$0xff]  ;;  %v3114_v27 = vld [vmem:[%s4040_s0 + $0x318] sm:$0xff] }
   0xa   :  { %1114 = vmatpush.bf16.msra.mxu0 %v3148_v2  ;;  %3165 = vmatpush.bf16.msra.mxu1 %v3148_v2  ;;  %v3051_v25 = vld [vmem:[%s4040_s0 + $0x120] sm:$0xff]  ;;  %v3020_v28 = vld [vmem:[%s4040_s0 + $0x28] sm:$0xff]  ;;  %v3082_v30 = vld [vmem:[%s4040_s0 + $0x218] sm:$0xff] }
   0xb   :  { %3166 = vmatpush.bf16.msra.mxu2 %v3148_v2  ;;  %3167 = vmatpush.bf16.msra.mxu3 %v3148_v2  ;;  %v3052_v29 = vld [vmem:[%s4040_s0 + $0x128] sm:$0xff]  ;;  %v3115_v31 = vld [vmem:[%s4040_s0 + $0x320] sm:$0xff]  ;;  %v3021_v32 = vld [vmem:[%s4040_s0 + $0x30] sm:$0xff] }
   0xc   :  { %v3053_v33 = vld [vmem:[%s4040_s0 + $0x130] sm:$0xff]  ;;  %v3083_v34 = vld [vmem:[%s4040_s0 + $0x220] sm:$0xff]  ;;  %v3116_v35 = vld [vmem:[%s4040_s0 + $0x328] sm:$0xff] }
   0xd   :  { %v3022_v36 = vld [vmem:[%s4040_s0 + $0x38] sm:$0xff]  ;;  %v3084_v38 = vld [vmem:[%s4040_s0 + $0x228] sm:$0xff]  ;;  %v3117_v39 = vld [vmem:[%s4040_s0 + $0x330] sm:$0xff] }
   0xe   :  { %1115 = vmatpush.bf16.msra.mxu0 %v3147_v3  ;;  %3168 = vmatpush.bf16.msra.mxu1 %v3147_v3  ;;  %v3054_v37 = vld [vmem:[%s4040_s0 + $0x138] sm:$0xff]  ;;  %v3023_v40 = vld [vmem:[%s4040_s0 + $0x40] sm:$0xff]  ;;  %v3085_v44 = vld [vmem:[%s4040_s0 + $0x230] sm:$0xff] }
   0xf   :  { %3169 = vmatpush.bf16.msra.mxu2 %v3147_v3  ;;  %3170 = vmatpush.bf16.msra.mxu3 %v3147_v3  ;;  %v3055_v41 = vld [vmem:[%s4040_s0 + $0x140] sm:$0xff]  ;;  %v3118_v45 = vld [vmem:[%s4040_s0 + $0x338] sm:$0xff]  ;;  %v3024_v63 = vld [vmem:[%s4040_s0 + $0x48] sm:$0xff] }
  0x10   :  { %v3352_v46 = vld [vmem:[%s4039_s2] ss:$0 sm:$0xff]  ;;  %v3056_v0 = vld [vmem:[%s4040_s0 + $0x148] sm:$0xff]  ;;  %v3086_v3 = vld [vmem:[%s4040_s0 + $0x238] sm:$0xff] }
  0x12   :  { %1116 = vmatpush.bf16.msra.mxu0 %v3146_v4  ;;  %3171 = vmatpush.bf16.msra.mxu1 %v3146_v4 }
  0x13   :  { %3172 = vmatpush.bf16.msra.mxu2 %v3146_v4  ;;  %3173 = vmatpush.bf16.msra.mxu3 %v3146_v4  ;;  %v3119_v4 = vld [vmem:[%s4040_s0 + $0x340] sm:$0xff] }
  0x16   :  { %1117 = vmatpush.bf16.msra.mxu0 %v3145_v5  ;;  %3174 = vmatpush.bf16.msra.mxu1 %v3145_v5 }
  0x17   :  { %3175 = vmatpush.bf16.msra.mxu2 %v3145_v5  ;;  %3176 = vmatpush.bf16.msra.mxu3 %v3145_v5 }
  0x1a   :  { %1118 = vmatpush.bf16.msra.mxu0 %v3144_v6  ;;  %3177 = vmatpush.bf16.msra.mxu1 %v3144_v6 }
  0x1b   :  { %3178 = vmatpush.bf16.msra.mxu2 %v3144_v6  ;;  %3179 = vmatpush.bf16.msra.mxu3 %v3144_v6 }
  0x1e   :  { %1119 = vmatpush.bf16.msra.mxu0 %v3143_v7  ;;  %3180 = vmatpush.bf16.msra.mxu1 %v3143_v7 }
  0x1f   :  { %3181 = vmatpush.bf16.msra.mxu2 %v3143_v7  ;;  %3182 = vmatpush.bf16.msra.mxu3 %v3143_v7 }
  0x21   :  { %1120 = vmatmul.bf16.vlgmr.msra.gmra.mxu0 %v3015_v8  ;;  %1280 = vmatmul.bf16.vlgmr.msra.gmra.mxu1 %v3047_v9 }
  0x22   :  { %1430 = vmatmul.bf16.vlgmr.msra.gmra.mxu2 %v3077_v10  ;;  %1595 = vmatmul.bf16.vlgmr.msra.gmra.mxu3 %v3110_v11 }
  0x31   :  { %1125 = vmatmul.bf16.gmra.mxu0 %v3016_v12  ;;  %1285 = vmatmul.bf16.gmra.mxu1 %v3048_v13 }
  0x32   :  { %1435 = vmatmul.bf16.gmra.mxu2 %v3078_v14  ;;  %1600 = vmatmul.bf16.gmra.mxu3 %v3111_v15 }
  0x41   :  { %1130 = vmatmul.bf16.gmra.mxu0 %v3017_v16  ;;  %1290 = vmatmul.bf16.gmra.mxu1 %v3049_v17 }
  0x42   :  { %1440 = vmatmul.bf16.gmra.mxu2 %v3079_v18  ;;  %1605 = vmatmul.bf16.gmra.mxu3 %v3112_v19 }
  0x51   :  { %1135 = vmatmul.bf16.gmra.mxu0 %v3018_v20  ;;  %1295 = vmatmul.bf16.gmra.mxu1 %v3050_v21 }
  0x52   :  { %1445 = vmatmul.bf16.gmra.mxu2 %v3080_v22  ;;  %1610 = vmatmul.bf16.gmra.mxu3 %v3113_v23 }
  0x61   :  { %1140 = vmatmul.bf16.gmra.mxu0 %v3019_v24  ;;  %1300 = vmatmul.bf16.gmra.mxu1 %v3051_v25  ;;  %v3025_v24 = vld [vmem:[%s4040_s0 + $0x50] sm:$0xff] }
  0x62   :  { %1450 = vmatmul.bf16.gmra.mxu2 %v3081_v26  ;;  %1615 = vmatmul.bf16.gmra.mxu3 %v3114_v27  ;;  %v3057_v25 = vld [vmem:[%s4040_s0 + $0x150] sm:$0xff] }
  0x71   :  { %1145 = vmatmul.bf16.gmra.mxu0 %v3020_v28  ;;  %1305 = vmatmul.bf16.gmra.mxu1 %v3052_v29  ;;  %v3087_v29 = vld [vmem:[%s4040_s0 + $0x240] sm:$0xff] }
  0x72   :  { %1455 = vmatmul.bf16.gmra.mxu2 %v3082_v30  ;;  %1620 = vmatmul.bf16.gmra.mxu3 %v3115_v31  ;;  %v3120_v30 = vld [vmem:[%s4040_s0 + $0x348] sm:$0xff] }
  0x81   :  { %1150 = vmatmul.bf16.gmra.mxu0 %v3021_v32  ;;  %1310 = vmatmul.bf16.gmra.mxu1 %v3053_v33 }
  0x82   :  { %1460 = vmatmul.bf16.gmra.mxu2 %v3083_v34  ;;  %1625 = vmatmul.bf16.gmra.mxu3 %v3116_v35 }
  0x91   :  { %1155 = vmatmul.bf16.gmra.mxu0 %v3022_v36  ;;  %1315 = vmatmul.bf16.gmra.mxu1 %v3054_v37 }
  0x92   :  { %1465 = vmatmul.bf16.gmra.mxu2 %v3084_v38  ;;  %1630 = vmatmul.bf16.gmra.mxu3 %v3117_v39 }
  0x9e   :  { %v1121_v42 = vpop.f32.mrf.mxu0  ;;  %v1281_v43 = vpop.f32.mrf.mxu1 }
  0x9f   :  { %v1122_v47 = vadd.f32 %v3352_v46, %v1121_v42  ;;  %v1282_v48 = vadd.f32 %v3352_v46, %v1281_v43 }
  0xa1   :  { %1160 = vmatmul.bf16.gmra.mxu0 %v3023_v40  ;;  %1320 = vmatmul.bf16.gmra.mxu1 %v3055_v41  ;;  %v1761_v53 = vmax.f32 %v1122_v47, 0.0  ;;  %v1825_v54 = vmax.f32 %v1282_v48, 0.0 }
  0xa2   :  { %1470 = vmatmul.bf16.gmra.mxu2 %v3085_v44  ;;  %1635 = vmatmul.bf16.gmra.mxu3 %v3118_v45 }
  0xa5   :  { %v3356_v49 = vpop.f32.mrf.mxu2  ;;  %v3358_v50 = vpop.f32.mrf.mxu3 }
  0xa6   :  { %v1123_v51 = vpop.f32.mrf.mxu0  ;;  %v1283_v52 = vpop.f32.mrf.mxu1 }
  0xa7   :  { %v1124_v55 = vadd.f32 %v3352_v46, %v1123_v51  ;;  %v1284_v56 = vadd.f32 %v3352_v46, %v1283_v52 }
  0xa9   :  { %v1762_v57 = vmax.f32 %v1124_v55, 0.0  ;;  %v1826_v58 = vmax.f32 %v1284_v56, 0.0 }
  0xab   :  { %v2017_v59 = vadd.f32 %v1762_v57, %v1761_v53  ;;  %v2091_v60 = vadd.f32 %v1826_v58, %v1825_v54 }
  0xad   :  { %v3362_v61 = vpop.f32.mrf.mxu2  ;;  %v3364_v62 = vpop.f32.mrf.mxu3 }
  0xae   :  { %v1126_v1 = vpop.f32.mrf.mxu0  ;;  %v1286_v2 = vpop.f32.mrf.mxu1 }
  0xaf   :  { %v1127_v5 = vadd.f32 %v3352_v46, %v1126_v1  ;;  %v1287_v6 = vadd.f32 %v3352_v46, %v1286_v2 }
  0xb1   :  { %v1763_v7 = vmax.f32 %v1127_v5, 0.0  ;;  %v1827_v8 = vmax.f32 %v1287_v6, 0.0  ;;  %1165 = vmatmul.bf16.gmra.mxu0 %v3024_v63  ;;  %1325 = vmatmul.bf16.gmra.mxu1 %v3056_v0 }
  0xb2   :  { %1475 = vmatmul.bf16.gmra.mxu2 %v3086_v3  ;;  %1640 = vmatmul.bf16.gmra.mxu3 %v3119_v4  ;;  %v3088_v3 = vld [vmem:[%s4040_s0 + $0x248] sm:$0xff]  ;;  %v3121_v4 = vld [vmem:[%s4040_s0 + $0x350] sm:$0xff] }
  0xb3   :  { %v2018_v9 = vadd.f32 %v2017_v59, %v1763_v7  ;;  %v2092_v10 = vadd.f32 %v2091_v60, %v1827_v8  ;;  %v3026_v59 = vld [vmem:[%s4040_s0 + $0x58] sm:$0xff] }
  0xb4   :  { %v3058_v60 = vld [vmem:[%s4040_s0 + $0x158] sm:$0xff] }
  0xb5   :  { %v3380_v11 = vpop.f32.mrf.mxu2  ;;  %v1601_v12 = vpop.f32.mrf.mxu3 }
  0xb6   :  { %v1128_v13 = vpop.f32.mrf.mxu0  ;;  %v1288_v14 = vpop.f32.mrf.mxu1  ;;  %v1602_v21 = vadd.f32 %v3352_v46, %v1601_v12 }
  0xb7   :  { %v1129_v15 = vadd.f32 %v3352_v46, %v1128_v13  ;;  %v1289_v16 = vadd.f32 %v3352_v46, %v1288_v14 }
  0xb8   :  { %v1953_v33 = vmax.f32 %v1602_v21, 0.0 }
  0xb9   :  { %v1764_v17 = vmax.f32 %v1129_v15, 0.0  ;;  %v1828_v18 = vmax.f32 %v1289_v16, 0.0  ;;  %v3158_v15 = vld [vmem:[%s4041_s3 + $0x38] sm:$0xff] }
  0xba   :  { %2421 = vmatpush.bf16.msrb.mxu1 %v3158_v15  ;;  %v3028_v15 = vld [vmem:[%s4040_s0 + $0x68] sm:$0xff] }
  0xbb   :  { %v2019_v19 = vadd.f32 %v2018_v9, %v1764_v17  ;;  %v2093_v20 = vadd.f32 %v2092_v10, %v1828_v18 }
  0xbd   :  { %v3385_v22 = vpop.f32.mrf.mxu2  ;;  %v1603_v23 = vpop.f32.mrf.mxu3 }
  0xbe   :  { %v1604_v26 = vadd.f32 %v3352_v46, %v1603_v23  ;;  %v1131_v27 = vpop.f32.mrf.mxu0  ;;  %v1291_v28 = vpop.f32.mrf.mxu1 }
  0xbf   :  { %v1132_v31 = vadd.f32 %v3352_v46, %v1131_v27  ;;  %v1292_v32 = vadd.f32 %v3352_v46, %v1291_v28 }
  0xc0   :  { %v1954_v34 = vmax.f32 %v1604_v26, 0.0 }
  0xc1   :  { %v1765_v35 = vmax.f32 %v1132_v31, 0.0  ;;  %v1829_v36 = vmax.f32 %v1292_v32, 0.0  ;;  %1170 = vmatmul.bf16.gmra.mxu0 %v3025_v24  ;;  %1330 = vmatmul.bf16.gmra.mxu1 %v3057_v25 }
  0xc2   :  { %v2239_v37 = vadd.f32 %v1954_v34, %v1953_v33  ;;  %1480 = vmatmul.bf16.gmra.mxu2 %v3087_v29  ;;  %1645 = vmatmul.bf16.gmra.mxu3 %v3120_v30 }
  0xc3   :  { %v2020_v38 = vadd.f32 %v2019_v19, %v1765_v35  ;;  %v2094_v39 = vadd.f32 %v2093_v20, %v1829_v36 }
  0xc5   :  { %v1441_v40 = vpop.f32.mrf.mxu2  ;;  %v1606_v41 = vpop.f32.mrf.mxu3 }
  0xc6   :  { %v1607_v42 = vadd.f32 %v3352_v46, %v1606_v41  ;;  %v1133_v43 = vpop.f32.mrf.mxu0  ;;  %v1293_v44 = vpop.f32.mrf.mxu1  ;;  %v1442_v56 = vadd.f32 %v3352_v46, %v1441_v40 }
  0xc7   :  { %v1134_v45 = vadd.f32 %v3352_v46, %v1133_v43  ;;  %v1294_v47 = vadd.f32 %v3352_v46, %v1293_v44  ;;  %v3089_v43 = vld [vmem:[%s4040_s0 + $0x250] sm:$0xff]  ;;  %v3122_v44 = vld [vmem:[%s4040_s0 + $0x358] sm:$0xff] }
  0xc8   :  { %v1955_v48 = vmax.f32 %v1607_v42, 0.0  ;;  %v1889_v7 = vmax.f32 %v1442_v56, 0.0 }
  0xc9   :  { %v1766_v51 = vmax.f32 %v1134_v45, 0.0  ;;  %v1830_v52 = vmax.f32 %v1294_v47, 0.0 }
  0xca   :  { %v2240_v53 = vadd.f32 %v2239_v37, %v1955_v48  ;;  %v3027_v37 = vld [vmem:[%s4040_s0 + $0x60] sm:$0xff] }
  0xcb   :  { %v2021_v54 = vadd.f32 %v2020_v38, %v1766_v51  ;;  %v2095_v55 = vadd.f32 %v2094_v39, %v1830_v52  ;;  %v3059_v38 = vld [vmem:[%s4040_s0 + $0x160] sm:$0xff] }
  0xcd   :  { %v1443_v57 = vpop.f32.mrf.mxu2  ;;  %v1608_v58 = vpop.f32.mrf.mxu3 }
  0xce   :  { %v1444_v63 = vadd.f32 %v3352_v46, %v1443_v57  ;;  %v1609_v0 = vadd.f32 %v3352_v46, %v1608_v58  ;;  %v1136_v1 = vpop.f32.mrf.mxu0  ;;  %v1296_v2 = vpop.f32.mrf.mxu1 }
  0xcf   :  { %v1137_v5 = vadd.f32 %v3352_v46, %v1136_v1  ;;  %v1297_v6 = vadd.f32 %v3352_v46, %v1296_v2 }
  0xd0   :  { %v1890_v8 = vmax.f32 %v1444_v63, 0.0  ;;  %v1956_v9 = vmax.f32 %v1609_v0, 0.0 }
  0xd1   :  { %v1767_v10 = vmax.f32 %v1137_v5, 0.0  ;;  %v1831_v12 = vmax.f32 %v1297_v6, 0.0  ;;  %1175 = vmatmul.bf16.gmra.mxu0 %v3026_v59  ;;  %1335 = vmatmul.bf16.gmra.mxu1 %v3058_v60 }
  0xd2   :  { %v2165_v13 = vadd.f32 %v1890_v8, %v1889_v7  ;;  %v2241_v14 = vadd.f32 %v2240_v53, %v1956_v9  ;;  %1485 = vmatmul.bf16.gmra.mxu2 %v3088_v3  ;;  %1650 = vmatmul.bf16.gmra.mxu3 %v3121_v4 }
  0xd3   :  { %v2022_v16 = vadd.f32 %v2021_v54, %v1767_v10  ;;  %v2096_v17 = vadd.f32 %v2095_v55, %v1831_v12 }
  0xd5   :  { %v1446_v18 = vpop.f32.mrf.mxu2  ;;  %v1611_v19 = vpop.f32.mrf.mxu3 }
  0xd6   :  { %v1447_v20 = vadd.f32 %v3352_v46, %v1446_v18  ;;  %v1612_v21 = vadd.f32 %v3352_v46, %v1611_v19  ;;  %v1138_v23 = vpop.f32.mrf.mxu0  ;;  %v1298_v24 = vpop.f32.mrf.mxu1 }
  0xd7   :  { %v1139_v25 = vadd.f32 %v3352_v46, %v1138_v23  ;;  %v1299_v26 = vadd.f32 %v3352_v46, %v1298_v24  ;;  %v3123_v23 = vld [vmem:[%s4040_s0 + $0x360] sm:$0xff] }
  0xd8   :  { %v1891_v27 = vmax.f32 %v1447_v20, 0.0  ;;  %v1957_v28 = vmax.f32 %v1612_v21, 0.0  ;;  %v3090_v21 = vld [vmem:[%s4040_s0 + $0x258] sm:$0xff] }
  0xd9   :  { %v1768_v29 = vmax.f32 %v1139_v25, 0.0  ;;  %v1832_v30 = vmax.f32 %v1299_v26, 0.0 }
  0xda   :  { %v2166_v31 = vadd.f32 %v2165_v13, %v1891_v27  ;;  %v2242_v32 = vadd.f32 %v2241_v14, %v1957_v28 }
  0xdb   :  { %v2023_v33 = vadd.f32 %v2022_v16, %v1768_v29  ;;  %v2097_v34 = vadd.f32 %v2096_v17, %v1832_v30  ;;  %v3060_v16 = vld [vmem:[%s4040_s0 + $0x168] sm:$0xff] }
  0xdd   :  { %v1448_v35 = vpop.f32.mrf.mxu2  ;;  %v1613_v36 = vpop.f32.mrf.mxu3 }
  0xde   :  { %v1449_v39 = vadd.f32 %v3352_v46, %v1448_v35  ;;  %v1614_v40 = vadd.f32 %v3352_v46, %v1613_v36  ;;  %v1141_v41 = vpop.f32.mrf.mxu0  ;;  %v1301_v42 = vpop.f32.mrf.mxu1 }
  0xdf   :  { %v1142_v45 = vadd.f32 %v3352_v46, %v1141_v41  ;;  %v1302_v47 = vadd.f32 %v3352_v46, %v1301_v42 }
  0xe0   :  { %v1892_v48 = vmax.f32 %v1449_v39, 0.0  ;;  %v1958_v51 = vmax.f32 %v1614_v40, 0.0 }
  0xe1   :  { %v1769_v52 = vmax.f32 %v1142_v45, 0.0  ;;  %v1833_v53 = vmax.f32 %v1302_v47, 0.0  ;;  %1180 = vmatmul.bf16.gmra.mxu0 %v3027_v37  ;;  %1340 = vmatmul.bf16.gmra.mxu1 %v3059_v38 }
  0xe2   :  { %v2167_v54 = vadd.f32 %v2166_v31, %v1892_v48  ;;  %v2243_v55 = vadd.f32 %v2242_v32, %v1958_v51  ;;  %1490 = vmatmul.bf16.gmra.mxu2 %v3089_v43  ;;  %1655 = vmatmul.bf16.gmra.mxu3 %v3122_v44 }
  0xe3   :  { %v2024_v56 = vadd.f32 %v2023_v33, %v1769_v52  ;;  %v2098_v57 = vadd.f32 %v2097_v34, %v1833_v53 }
  0xe5   :  { %v1451_v58 = vpop.f32.mrf.mxu2  ;;  %v1616_v59 = vpop.f32.mrf.mxu3 }
  0xe6   :  { %v1452_v60 = vadd.f32 %v3352_v46, %v1451_v58  ;;  %v1617_v63 = vadd.f32 %v3352_v46, %v1616_v59  ;;  %v1143_v0 = vpop.f32.mrf.mxu0  ;;  %v1303_v1 = vpop.f32.mrf.mxu1 }
  0xe7   :  { %v1144_v2 = vadd.f32 %v3352_v46, %v1143_v0  ;;  %v1304_v3 = vadd.f32 %v3352_v46, %v1303_v1  ;;  %v3124_v0 = vld [vmem:[%s4040_s0 + $0x368] sm:$0xff] }
  0xe8   :  { %v1893_v4 = vmax.f32 %v1452_v60, 0.0  ;;  %v1959_v5 = vmax.f32 %v1617_v63, 0.0  ;;  %v3091_v63 = vld [vmem:[%s4040_s0 + $0x260] sm:$0xff] }
  0xe9   :  { %v1770_v6 = vmax.f32 %v1144_v2, 0.0  ;;  %v1834_v7 = vmax.f32 %v1304_v3, 0.0 }
  0xea   :  { %v2168_v8 = vadd.f32 %v2167_v54, %v1893_v4  ;;  %v2244_v9 = vadd.f32 %v2243_v55, %v1959_v5  ;;  %v3029_v55 = vld [vmem:[%s4040_s0 + $0x70] sm:$0xff] }
  0xeb   :  { %v2025_v10 = vadd.f32 %v2024_v56, %v1770_v6  ;;  %v2099_v12 = vadd.f32 %v2098_v57, %v1834_v7  ;;  %v3061_v56 = vld [vmem:[%s4040_s0 + $0x170] sm:$0xff] }
  0xed   :  { %v1453_v13 = vpop.f32.mrf.mxu2  ;;  %v1618_v14 = vpop.f32.mrf.mxu3 }
  0xee   :  { %v1454_v17 = vadd.f32 %v3352_v46, %v1453_v13  ;;  %v1619_v18 = vadd.f32 %v3352_v46, %v1618_v14  ;;  %v1146_v19 = vpop.f32.mrf.mxu0  ;;  %v1306_v20 = vpop.f32.mrf.mxu1 }
  0xef   :  { %v1147_v24 = vadd.f32 %v3352_v46, %v1146_v19  ;;  %v1307_v25 = vadd.f32 %v3352_v46, %v1306_v20 }
  0xf0   :  { %v1894_v26 = vmax.f32 %v1454_v17, 0.0  ;;  %v1960_v27 = vmax.f32 %v1619_v18, 0.0 }
  0xf1   :  { %v1771_v28 = vmax.f32 %v1147_v24, 0.0  ;;  %v1835_v29 = vmax.f32 %v1307_v25, 0.0  ;;  %1185 = vmatmul.bf16.gmra.mxu0 %v3028_v15  ;;  %1345 = vmatmul.bf16.gmra.mxu1 %v3060_v16 }
  0xf2   :  { %v2169_v30 = vadd.f32 %v2168_v8, %v1894_v26  ;;  %v2245_v31 = vadd.f32 %v2244_v9, %v1960_v27  ;;  %1495 = vmatmul.bf16.gmra.mxu2 %v3090_v21  ;;  %1660 = vmatmul.bf16.gmra.mxu3 %v3123_v23 }
  0xf3   :  { %v2026_v32 = vadd.f32 %v2025_v10, %v1771_v28  ;;  %v2100_v33 = vadd.f32 %v2099_v12, %v1835_v29  ;;  %v3157_v29 = vld [vmem:[%s4041_s3 + $0x30] sm:$0xff] }
  0xf4   :  { %2422 = vmatpush.bf16.msrb.mxu1 %v3157_v29 }
  0xf5   :  { %v1456_v34 = vpop.f32.mrf.mxu2  ;;  %v1621_v35 = vpop.f32.mrf.mxu3 }
  0xf6   :  { %v1457_v36 = vadd.f32 %v3352_v46, %v1456_v34  ;;  %v1622_v37 = vadd.f32 %v3352_v46, %v1621_v35  ;;  %v1148_v38 = vpop.f32.mrf.mxu0  ;;  %v1308_v39 = vpop.f32.mrf.mxu1 }
  0xf7   :  { %v1149_v40 = vadd.f32 %v3352_v46, %v1148_v38  ;;  %v1309_v41 = vadd.f32 %v3352_v46, %v1308_v39  ;;  %v3092_v38 = vld [vmem:[%s4040_s0 + $0x268] sm:$0xff]  ;;  %v3125_v39 = vld [vmem:[%s4040_s0 + $0x370] sm:$0xff] }
  0xf8   :  { %v1895_v42 = vmax.f32 %v1457_v36, 0.0  ;;  %v1961_v43 = vmax.f32 %v1622_v37, 0.0 }
  0xf9   :  { %v1772_v44 = vmax.f32 %v1149_v40, 0.0  ;;  %v1836_v45 = vmax.f32 %v1309_v41, 0.0 }
  0xfa   :  { %v2170_v47 = vadd.f32 %v2169_v30, %v1895_v42  ;;  %v2246_v48 = vadd.f32 %v2245_v31, %v1961_v43 }
  0xfb   :  { %v2027_v51 = vadd.f32 %v2026_v32, %v1772_v44  ;;  %v2101_v52 = vadd.f32 %v2100_v33, %v1836_v45  ;;  %v3030_v32 = vld [vmem:[%s4040_s0 + $0x78] sm:$0xff] }
  0xfc   :  { %v3062_v33 = vld [vmem:[%s4040_s0 + $0x178] sm:$0xff] }
  0xfd   :  { %v1458_v53 = vpop.f32.mrf.mxu2  ;;  %v1623_v54 = vpop.f32.mrf.mxu3 }
  0xfe   :  { %v1459_v57 = vadd.f32 %v3352_v46, %v1458_v53  ;;  %v1624_v58 = vadd.f32 %v3352_v46, %v1623_v54  ;;  %v1151_v59 = vpop.f32.mrf.mxu0  ;;  %v1311_v60 = vpop.f32.mrf.mxu1 }
  0xff   :  { %v1152_v1 = vadd.f32 %v3352_v46, %v1151_v59  ;;  %v1312_v2 = vadd.f32 %v3352_v46, %v1311_v60 }
 0x100   :  { %v1896_v3 = vmax.f32 %v1459_v57, 0.0  ;;  %v1962_v4 = vmax.f32 %v1624_v58, 0.0 }
 0x101   :  { %v1773_v5 = vmax.f32 %v1152_v1, 0.0  ;;  %v1837_v6 = vmax.f32 %v1312_v2, 0.0  ;;  %1190 = vmatmul.bf16.gmra.mxu0 %v3029_v55  ;;  %1350 = vmatmul.bf16.gmra.mxu1 %v3061_v56 }
 0x102   :  { %v2171_v7 = vadd.f32 %v2170_v47, %v1896_v3  ;;  %v2247_v8 = vadd.f32 %v2246_v48, %v1962_v4  ;;  %1500 = vmatmul.bf16.gmra.mxu2 %v3091_v63  ;;  %1665 = vmatmul.bf16.gmra.mxu3 %v3124_v0 }
 0x103   :  { %v2028_v9 = vadd.f32 %v2027_v51, %v1773_v5  ;;  %v2102_v10 = vadd.f32 %v2101_v52, %v1837_v6 }
 0x105   :  { %v1461_v12 = vpop.f32.mrf.mxu2  ;;  %v1626_v13 = vpop.f32.mrf.mxu3 }
 0x106   :  { %v1462_v14 = vadd.f32 %v3352_v46, %v1461_v12  ;;  %v1627_v15 = vadd.f32 %v3352_v46, %v1626_v13  ;;  %v1153_v16 = vpop.f32.mrf.mxu0  ;;  %v1313_v17 = vpop.f32.mrf.mxu1 }
 0x107   :  { %v1154_v18 = vadd.f32 %v3352_v46, %v1153_v16  ;;  %v1314_v19 = vadd.f32 %v3352_v46, %v1313_v17  ;;  %v3093_v16 = vld [vmem:[%s4040_s0 + $0x270] sm:$0xff]  ;;  %v3126_v17 = vld [vmem:[%s4040_s0 + $0x378] sm:$0xff] }
 0x108   :  { %v1897_v20 = vmax.f32 %v1462_v14, 0.0  ;;  %v1963_v21 = vmax.f32 %v1627_v15, 0.0 }
 0x109   :  { %v1774_v23 = vmax.f32 %v1154_v18, 0.0  ;;  %v1838_v24 = vmax.f32 %v1314_v19, 0.0 }
 0x10a   :  { %v2172_v25 = vadd.f32 %v2171_v7, %v1897_v20  ;;  %v2248_v26 = vadd.f32 %v2247_v8, %v1963_v21 }
 0x10b   :  { %v2029_v27 = vadd.f32 %v2028_v9, %v1774_v23  ;;  %v2103_v28 = vadd.f32 %v2102_v10, %v1838_v24  ;;  %v3031_v9 = vld [vmem:[%s4040_s0 + $0x80] sm:$0xff] }
 0x10c   :  { %v3063_v10 = vld [vmem:[%s4040_s0 + $0x180] sm:$0xff] }
 0x10d   :  { %v1463_v30 = vpop.f32.mrf.mxu2  ;;  %v1628_v31 = vpop.f32.mrf.mxu3 }
 0x10e   :  { %v1464_v34 = vadd.f32 %v3352_v46, %v1463_v30  ;;  %v1629_v35 = vadd.f32 %v3352_v46, %v1628_v31  ;;  %v1156_v36 = vpop.f32.mrf.mxu0  ;;  %v1316_v37 = vpop.f32.mrf.mxu1 }
 0x10f   :  { %v1157_v40 = vadd.f32 %v3352_v46, %v1156_v36  ;;  %v1317_v41 = vadd.f32 %v3352_v46, %v1316_v37 }
 0x110   :  { %v1898_v42 = vmax.f32 %v1464_v34, 0.0  ;;  %v1964_v43 = vmax.f32 %v1629_v35, 0.0 }
 0x111   :  { %v1775_v44 = vmax.f32 %v1157_v40, 0.0  ;;  %v1839_v45 = vmax.f32 %v1317_v41, 0.0  ;;  %1195 = vmatmul.bf16.gmra.mxu0 %v3030_v32  ;;  %1355 = vmatmul.bf16.gmra.mxu1 %v3062_v33 }
 0x112   :  { %v2173_v47 = vadd.f32 %v2172_v25, %v1898_v42  ;;  %v2249_v48 = vadd.f32 %v2248_v26, %v1964_v43  ;;  %1505 = vmatmul.bf16.gmra.mxu2 %v3092_v38  ;;  %1670 = vmatmul.bf16.gmra.mxu3 %v3125_v39 }
 0x113   :  { %v2030_v51 = vadd.f32 %v2029_v27, %v1775_v44  ;;  %v2104_v52 = vadd.f32 %v2103_v28, %v1839_v45 }
 0x115   :  { %v1466_v53 = vpop.f32.mrf.mxu2  ;;  %v1631_v54 = vpop.f32.mrf.mxu3 }
 0x116   :  { %v1467_v55 = vadd.f32 %v3352_v46, %v1466_v53  ;;  %v1632_v56 = vadd.f32 %v3352_v46, %v1631_v54  ;;  %v1158_v57 = vpop.f32.mrf.mxu0  ;;  %v1318_v58 = vpop.f32.mrf.mxu1 }
 0x117   :  { %v1159_v59 = vadd.f32 %v3352_v46, %v1158_v57  ;;  %v1319_v60 = vadd.f32 %v3352_v46, %v1318_v58  ;;  %v3127_v57 = vld [vmem:[%s4040_s0 + $0x380] sm:$0xff] }
 0x118   :  { %v1899_v63 = vmax.f32 %v1467_v55, 0.0  ;;  %v1965_v0 = vmax.f32 %v1632_v56, 0.0  ;;  %v3094_v56 = vld [vmem:[%s4040_s0 + $0x278] sm:$0xff] }
 0x119   :  { %v1776_v1 = vmax.f32 %v1159_v59, 0.0  ;;  %v1840_v2 = vmax.f32 %v1319_v60, 0.0 }
 0x11a   :  { %v2174_v3 = vadd.f32 %v2173_v47, %v1899_v63  ;;  %v2250_v4 = vadd.f32 %v2249_v48, %v1965_v0  ;;  %v3032_v48 = vld [vmem:[%s4040_s0 + $0x88] sm:$0xff] }
 0x11b   :  { %v2031_v5 = vadd.f32 %v2030_v51, %v1776_v1  ;;  %v2105_v6 = vadd.f32 %v2104_v52, %v1840_v2  ;;  %v3064_v51 = vld [vmem:[%s4040_s0 + $0x188] sm:$0xff] }
 0x11d   :  { %v1468_v7 = vpop.f32.mrf.mxu2  ;;  %v1633_v8 = vpop.f32.mrf.mxu3 }
 0x11e   :  { %v1469_v12 = vadd.f32 %v3352_v46, %v1468_v7  ;;  %v1634_v13 = vadd.f32 %v3352_v46, %v1633_v8  ;;  %v1161_v14 = vpop.f32.mrf.mxu0  ;;  %v1321_v15 = vpop.f32.mrf.mxu1 }
 0x11f   :  { %v1162_v18 = vadd.f32 %v3352_v46, %v1161_v14  ;;  %v1322_v19 = vadd.f32 %v3352_v46, %v1321_v15 }
 0x120   :  { %v1900_v20 = vmax.f32 %v1469_v12, 0.0  ;;  %v1966_v21 = vmax.f32 %v1634_v13, 0.0 }
 0x121   :  { %v1777_v23 = vmax.f32 %v1162_v18, 0.0  ;;  %v1841_v24 = vmax.f32 %v1322_v19, 0.0  ;;  %1200 = vmatmul.bf16.gmra.mxu0 %v3031_v9  ;;  %1360 = vmatmul.bf16.gmra.mxu1 %v3063_v10 }
 0x122   :  { %v2175_v25 = vadd.f32 %v2174_v3, %v1900_v20  ;;  %v2251_v26 = vadd.f32 %v2250_v4, %v1966_v21  ;;  %1510 = vmatmul.bf16.gmra.mxu2 %v3093_v16  ;;  %1675 = vmatmul.bf16.gmra.mxu3 %v3126_v17 }
 0x123   :  { %v2032_v27 = vadd.f32 %v2031_v5, %v1777_v23  ;;  %v2106_v28 = vadd.f32 %v2105_v6, %v1841_v24 }
 0x125   :  { %v1471_v29 = vpop.f32.mrf.mxu2  ;;  %v1636_v30 = vpop.f32.mrf.mxu3 }
 0x126   :  { %v1472_v31 = vadd.f32 %v3352_v46, %v1471_v29  ;;  %v1637_v32 = vadd.f32 %v3352_v46, %v1636_v30  ;;  %v1163_v33 = vpop.f32.mrf.mxu0  ;;  %v1323_v34 = vpop.f32.mrf.mxu1 }
 0x127   :  { %v1164_v35 = vadd.f32 %v3352_v46, %v1163_v33  ;;  %v1324_v36 = vadd.f32 %v3352_v46, %v1323_v34  ;;  %v3128_v33 = vld [vmem:[%s4040_s0 + $0x388] sm:$0xff] }
 0x128   :  { %v1901_v37 = vmax.f32 %v1472_v31, 0.0  ;;  %v1967_v38 = vmax.f32 %v1637_v32, 0.0  ;;  %v3095_v32 = vld [vmem:[%s4040_s0 + $0x280] sm:$0xff] }
 0x129   :  { %v1778_v39 = vmax.f32 %v1164_v35, 0.0  ;;  %v1842_v40 = vmax.f32 %v1324_v36, 0.0 }
 0x12a   :  { %v2176_v41 = vadd.f32 %v2175_v25, %v1901_v37  ;;  %v2252_v42 = vadd.f32 %v2251_v26, %v1967_v38  ;;  %v3033_v26 = vld [vmem:[%s4040_s0 + $0x90] sm:$0xff] }
 0x12b   :  { %v2033_v43 = vadd.f32 %v2032_v27, %v1778_v39  ;;  %v2107_v44 = vadd.f32 %v2106_v28, %v1842_v40  ;;  %v3065_v27 = vld [vmem:[%s4040_s0 + $0x190] sm:$0xff] }
 0x12d   :  { %v1473_v45 = vpop.f32.mrf.mxu2  ;;  %v1638_v47 = vpop.f32.mrf.mxu3 }
 0x12e   :  { %v1474_v52 = vadd.f32 %v3352_v46, %v1473_v45  ;;  %v1639_v53 = vadd.f32 %v3352_v46, %v1638_v47  ;;  %v1166_v54 = vpop.f32.mrf.mxu0  ;;  %v1326_v55 = vpop.f32.mrf.mxu1 }
 0x12f   :  { %v1167_v58 = vadd.f32 %v3352_v46, %v1166_v54  ;;  %v1327_v59 = vadd.f32 %v3352_v46, %v1326_v55 }
 0x130   :  { %v1902_v60 = vmax.f32 %v1474_v52, 0.0  ;;  %v1968_v63 = vmax.f32 %v1639_v53, 0.0 }
 0x131   :  { %v1779_v0 = vmax.f32 %v1167_v58, 0.0  ;;  %v1843_v1 = vmax.f32 %v1327_v59, 0.0  ;;  %1205 = vmatmul.bf16.gmra.mxu0 %v3032_v48  ;;  %1365 = vmatmul.bf16.gmra.mxu1 %v3064_v51 }
 0x132   :  { %v2177_v2 = vadd.f32 %v2176_v41, %v1902_v60  ;;  %v2253_v3 = vadd.f32 %v2252_v42, %v1968_v63  ;;  %1515 = vmatmul.bf16.gmra.mxu2 %v3094_v56  ;;  %1680 = vmatmul.bf16.gmra.mxu3 %v3127_v57  ;;  %v3156_v63 = vld [vmem:[%s4041_s3 + $0x28] sm:$0xff] }
 0x133   :  { %v2034_v4 = vadd.f32 %v2033_v43, %v1779_v0  ;;  %v2108_v5 = vadd.f32 %v2107_v44, %v1843_v1  ;;  %2423 = vmatpush.bf16.msrb.mxu1 %v3156_v63 }
 0x135   :  { %v1476_v6 = vpop.f32.mrf.mxu2  ;;  %v1641_v7 = vpop.f32.mrf.mxu3 }
 0x136   :  { %v1477_v8 = vadd.f32 %v3352_v46, %v1476_v6  ;;  %v1642_v9 = vadd.f32 %v3352_v46, %v1641_v7  ;;  %v1168_v10 = vpop.f32.mrf.mxu0  ;;  %v1328_v12 = vpop.f32.mrf.mxu1 }
 0x137   :  { %v1169_v13 = vadd.f32 %v3352_v46, %v1168_v10  ;;  %v1329_v14 = vadd.f32 %v3352_v46, %v1328_v12  ;;  %v3096_v10 = vld [vmem:[%s4040_s0 + $0x288] sm:$0xff]  ;;  %v3129_v12 = vld [vmem:[%s4040_s0 + $0x390] sm:$0xff] }
 0x138   :  { %v1903_v15 = vmax.f32 %v1477_v8, 0.0  ;;  %v1969_v16 = vmax.f32 %v1642_v9, 0.0 }
 0x139   :  { %v1780_v17 = vmax.f32 %v1169_v13, 0.0  ;;  %v1844_v18 = vmax.f32 %v1329_v14, 0.0 }
 0x13a   :  { %v2178_v19 = vadd.f32 %v2177_v2, %v1903_v15  ;;  %v2254_v20 = vadd.f32 %v2253_v3, %v1969_v16 }
 0x13b   :  { %v2035_v21 = vadd.f32 %v2034_v4, %v1780_v17  ;;  %v2109_v23 = vadd.f32 %v2108_v5, %v1844_v18  ;;  %v3034_v4 = vld [vmem:[%s4040_s0 + $0x98] sm:$0xff] }
 0x13c   :  { %v3066_v5 = vld [vmem:[%s4040_s0 + $0x198] sm:$0xff] }
 0x13d   :  { %v1478_v24 = vpop.f32.mrf.mxu2  ;;  %v1643_v25 = vpop.f32.mrf.mxu3 }
 0x13e   :  { %v1479_v28 = vadd.f32 %v3352_v46, %v1478_v24  ;;  %v1644_v29 = vadd.f32 %v3352_v46, %v1643_v25  ;;  %v1171_v30 = vpop.f32.mrf.mxu0  ;;  %v1331_v31 = vpop.f32.mrf.mxu1 }
 0x13f   :  { %v1172_v34 = vadd.f32 %v3352_v46, %v1171_v30  ;;  %v1332_v35 = vadd.f32 %v3352_v46, %v1331_v31 }
 0x140   :  { %v1904_v36 = vmax.f32 %v1479_v28, 0.0  ;;  %v1970_v37 = vmax.f32 %v1644_v29, 0.0 }
 0x141   :  { %v1781_v38 = vmax.f32 %v1172_v34, 0.0  ;;  %v1845_v39 = vmax.f32 %v1332_v35, 0.0  ;;  %1210 = vmatmul.bf16.gmra.mxu0 %v3033_v26  ;;  %1370 = vmatmul.bf16.gmra.mxu1 %v3065_v27 }
 0x142   :  { %v2179_v40 = vadd.f32 %v2178_v19, %v1904_v36  ;;  %v2255_v41 = vadd.f32 %v2254_v20, %v1970_v37  ;;  %1520 = vmatmul.bf16.gmra.mxu2 %v3095_v32  ;;  %1685 = vmatmul.bf16.gmra.mxu3 %v3128_v33 }
 0x143   :  { %v2036_v42 = vadd.f32 %v2035_v21, %v1781_v38  ;;  %v2110_v43 = vadd.f32 %v2109_v23, %v1845_v39 }
 0x145   :  { %v1481_v44 = vpop.f32.mrf.mxu2  ;;  %v1646_v45 = vpop.f32.mrf.mxu3 }
 0x146   :  { %v1482_v47 = vadd.f32 %v3352_v46, %v1481_v44  ;;  %v1647_v48 = vadd.f32 %v3352_v46, %v1646_v45  ;;  %v1173_v51 = vpop.f32.mrf.mxu0  ;;  %v1333_v52 = vpop.f32.mrf.mxu1 }
 0x147   :  { %v1174_v53 = vadd.f32 %v3352_v46, %v1173_v51  ;;  %v1334_v54 = vadd.f32 %v3352_v46, %v1333_v52  ;;  %v3097_v51 = vld [vmem:[%s4040_s0 + $0x290] sm:$0xff]  ;;  %v3130_v52 = vld [vmem:[%s4040_s0 + $0x398] sm:$0xff] }
 0x148   :  { %v1905_v55 = vmax.f32 %v1482_v47, 0.0  ;;  %v1971_v56 = vmax.f32 %v1647_v48, 0.0 }
 0x149   :  { %v1782_v57 = vmax.f32 %v1174_v53, 0.0  ;;  %v1846_v58 = vmax.f32 %v1334_v54, 0.0 }
 0x14a   :  { %v2180_v59 = vadd.f32 %v2179_v40, %v1905_v55  ;;  %v2256_v60 = vadd.f32 %v2255_v41, %v1971_v56 }
 0x14b   :  { %v2037_v0 = vadd.f32 %v2036_v42, %v1782_v57  ;;  %v2111_v1 = vadd.f32 %v2110_v43, %v1846_v58  ;;  %v3035_v42 = vld [vmem:[%s4040_s0 + $0xa0] sm:$0xff] }
 0x14c   :  { %v3067_v43 = vld [vmem:[%s4040_s0 + $0x1a0] sm:$0xff] }
 0x14d   :  { %v1483_v2 = vpop.f32.mrf.mxu2  ;;  %v1648_v3 = vpop.f32.mrf.mxu3 }
 0x14e   :  { %v1484_v6 = vadd.f32 %v3352_v46, %v1483_v2  ;;  %v1649_v7 = vadd.f32 %v3352_v46, %v1648_v3  ;;  %v1176_v8 = vpop.f32.mrf.mxu0  ;;  %v1336_v9 = vpop.f32.mrf.mxu1 }
 0x14f   :  { %v1177_v13 = vadd.f32 %v3352_v46, %v1176_v8  ;;  %v1337_v14 = vadd.f32 %v3352_v46, %v1336_v9 }
 0x150   :  { %v1906_v15 = vmax.f32 %v1484_v6, 0.0  ;;  %v1972_v16 = vmax.f32 %v1649_v7, 0.0 }
 0x151   :  { %v1783_v17 = vmax.f32 %v1177_v13, 0.0  ;;  %v1847_v18 = vmax.f32 %v1337_v14, 0.0  ;;  %1215 = vmatmul.bf16.gmra.mxu0 %v3034_v4  ;;  %1375 = vmatmul.bf16.gmra.mxu1 %v3066_v5 }
 0x152   :  { %v2181_v19 = vadd.f32 %v2180_v59, %v1906_v15  ;;  %v2257_v20 = vadd.f32 %v2256_v60, %v1972_v16  ;;  %1525 = vmatmul.bf16.gmra.mxu2 %v3096_v10  ;;  %1690 = vmatmul.bf16.gmra.mxu3 %v3129_v12 }
 0x153   :  { %v2038_v21 = vadd.f32 %v2037_v0, %v1783_v17  ;;  %v2112_v23 = vadd.f32 %v2111_v1, %v1847_v18 }
 0x155   :  { %v1486_v24 = vpop.f32.mrf.mxu2  ;;  %v1651_v25 = vpop.f32.mrf.mxu3 }
 0x156   :  { %v1487_v26 = vadd.f32 %v3352_v46, %v1486_v24  ;;  %v1652_v27 = vadd.f32 %v3352_v46, %v1651_v25  ;;  %v1178_v28 = vpop.f32.mrf.mxu0  ;;  %v1338_v29 = vpop.f32.mrf.mxu1 }
 0x157   :  { %v1179_v30 = vadd.f32 %v3352_v46, %v1178_v28  ;;  %v1339_v31 = vadd.f32 %v3352_v46, %v1338_v29  ;;  %v3131_v28 = vld [vmem:[%s4040_s0 + $0x3a0] sm:$0xff] }
 0x158   :  { %v1907_v32 = vmax.f32 %v1487_v26, 0.0  ;;  %v1973_v33 = vmax.f32 %v1652_v27, 0.0  ;;  %v3098_v27 = vld [vmem:[%s4040_s0 + $0x298] sm:$0xff] }
 0x159   :  { %v1784_v34 = vmax.f32 %v1179_v30, 0.0  ;;  %v1848_v35 = vmax.f32 %v1339_v31, 0.0 }
 0x15a   :  { %v2182_v36 = vadd.f32 %v2181_v19, %v1907_v32  ;;  %v2258_v37 = vadd.f32 %v2257_v20, %v1973_v33  ;;  %v3036_v20 = vld [vmem:[%s4040_s0 + $0xa8] sm:$0xff] }
 0x15b   :  { %v2039_v38 = vadd.f32 %v2038_v21, %v1784_v34  ;;  %v2113_v39 = vadd.f32 %v2112_v23, %v1848_v35  ;;  %v3068_v21 = vld [vmem:[%s4040_s0 + $0x1a8] sm:$0xff] }
 0x15d   :  { %v1488_v40 = vpop.f32.mrf.mxu2  ;;  %v1653_v41 = vpop.f32.mrf.mxu3 }
 0x15e   :  { %v1489_v44 = vadd.f32 %v3352_v46, %v1488_v40  ;;  %v1654_v45 = vadd.f32 %v3352_v46, %v1653_v41  ;;  %v1181_v47 = vpop.f32.mrf.mxu0  ;;  %v1341_v48 = vpop.f32.mrf.mxu1  ;;  %v3634_v41 = vld [vmem:[%s4039_s2] ss:$0 sm:$0xff] }
 0x15f   :  { %v1182_v53 = vadd.f32 %v3352_v46, %v1181_v47  ;;  %v1342_v54 = vadd.f32 %v3352_v46, %v1341_v48 }
 0x160   :  { %v1908_v55 = vmax.f32 %v1489_v44, 0.0  ;;  %v1974_v56 = vmax.f32 %v1654_v45, 0.0 }
 0x161   :  { %v1785_v57 = vmax.f32 %v1182_v53, 0.0  ;;  %v1849_v58 = vmax.f32 %v1342_v54, 0.0  ;;  %1220 = vmatmul.bf16.gmra.mxu0 %v3035_v42  ;;  %1380 = vmatmul.bf16.gmra.mxu1 %v3067_v43 }
 0x162   :  { %v2183_v59 = vadd.f32 %v2182_v36, %v1908_v55  ;;  %v2259_v60 = vadd.f32 %v2258_v37, %v1974_v56  ;;  %1530 = vmatmul.bf16.gmra.mxu2 %v3097_v51  ;;  %1695 = vmatmul.bf16.gmra.mxu3 %v3130_v52 }
 0x163   :  { %v2040_v63 = vadd.f32 %v2039_v38, %v1785_v57  ;;  %v2114_v0 = vadd.f32 %v2113_v39, %v1849_v58 }
 0x165   :  { %v1491_v1 = vpop.f32.mrf.mxu2  ;;  %v1656_v2 = vpop.f32.mrf.mxu3 }
 0x166   :  { %v1492_v3 = vadd.f32 %v3352_v46, %v1491_v1  ;;  %v1657_v4 = vadd.f32 %v3352_v46, %v1656_v2  ;;  %v1183_v5 = vpop.f32.mrf.mxu0  ;;  %v1343_v6 = vpop.f32.mrf.mxu1 }
 0x167   :  { %v1184_v7 = vadd.f32 %v3352_v46, %v1183_v5  ;;  %v1344_v8 = vadd.f32 %v3352_v46, %v1343_v6  ;;  %v3132_v5 = vld [vmem:[%s4040_s0 + $0x3a8] sm:$0xff] }
 0x168   :  { %v1909_v9 = vmax.f32 %v1492_v3, 0.0  ;;  %v1975_v10 = vmax.f32 %v1657_v4, 0.0  ;;  %v3099_v4 = vld [vmem:[%s4040_s0 + $0x2a0] sm:$0xff] }
 0x169   :  { %v1786_v12 = vmax.f32 %v1184_v7, 0.0  ;;  %v1850_v13 = vmax.f32 %v1344_v8, 0.0 }
 0x16a   :  { %v2184_v14 = vadd.f32 %v2183_v59, %v1909_v9  ;;  %v2260_v15 = vadd.f32 %v2259_v60, %v1975_v10  ;;  %v3037_v60 = vld [vmem:[%s4040_s0 + $0xb0] sm:$0xff] }
 0x16b   :  { %v2041_v16 = vadd.f32 %v2040_v63, %v1786_v12  ;;  %v2115_v17 = vadd.f32 %v2114_v0, %v1850_v13  ;;  %v3069_v63 = vld [vmem:[%s4040_s0 + $0x1b0] sm:$0xff] }
 0x16d   :  { %v1493_v18 = vpop.f32.mrf.mxu2  ;;  %v1658_v19 = vpop.f32.mrf.mxu3 }
 0x16e   :  { %v1494_v23 = vadd.f32 %v3352_v46, %v1493_v18  ;;  %v1659_v24 = vadd.f32 %v3352_v46, %v1658_v19  ;;  %v1186_v25 = vpop.f32.mrf.mxu0  ;;  %v1346_v26 = vpop.f32.mrf.mxu1 }
 0x16f   :  { %v1187_v29 = vadd.f32 %v3352_v46, %v1186_v25  ;;  %v1347_v30 = vadd.f32 %v3352_v46, %v1346_v26 }
 0x170   :  { %v1910_v31 = vmax.f32 %v1494_v23, 0.0  ;;  %v1976_v32 = vmax.f32 %v1659_v24, 0.0 }
 0x171   :  { %v1787_v33 = vmax.f32 %v1187_v29, 0.0  ;;  %v1851_v34 = vmax.f32 %v1347_v30, 0.0  ;;  %1225 = vmatmul.bf16.gmra.mxu0 %v3036_v20  ;;  %1385 = vmatmul.bf16.gmra.mxu1 %v3068_v21 }
 0x172   :  { %v2185_v35 = vadd.f32 %v2184_v14, %v1910_v31  ;;  %v2261_v36 = vadd.f32 %v2260_v15, %v1976_v32  ;;  %1535 = vmatmul.bf16.gmra.mxu2 %v3098_v27  ;;  %1700 = vmatmul.bf16.gmra.mxu3 %v3131_v28 }
 0x173   :  { %v2042_v37 = vadd.f32 %v2041_v16, %v1787_v33  ;;  %v2116_v38 = vadd.f32 %v2115_v17, %v1851_v34  ;;  %v3155_v34 = vld [vmem:[%s4041_s3 + $0x20] sm:$0xff] }
 0x174   :  { %2424 = vmatpush.bf16.msrb.mxu1 %v3155_v34 }
 0x175   :  { %v1496_v39 = vpop.f32.mrf.mxu2  ;;  %v1661_v40 = vpop.f32.mrf.mxu3 }
 0x176   :  { %v1497_v46 = vadd.f32 %v3634_v41, %v1496_v39  ;;  %v1662_v42 = vadd.f32 %v3634_v41, %v1661_v40  ;;  %v1188_v43 = vpop.f32.mrf.mxu0  ;;  %v1348_v44 = vpop.f32.mrf.mxu1 }
 0x177   :  { %v1189_v45 = vadd.f32 %v3634_v41, %v1188_v43  ;;  %v1349_v47 = vadd.f32 %v3634_v41, %v1348_v44  ;;  %v3100_v43 = vld [vmem:[%s4040_s0 + $0x2a8] sm:$0xff]  ;;  %v3133_v44 = vld [vmem:[%s4040_s0 + $0x3b0] sm:$0xff] }
 0x178   :  { %v1911_v48 = vmax.f32 %v1497_v46, 0.0  ;;  %v1977_v51 = vmax.f32 %v1662_v42, 0.0 }
 0x179   :  { %v1788_v52 = vmax.f32 %v1189_v45, 0.0  ;;  %v1852_v53 = vmax.f32 %v1349_v47, 0.0 }
 0x17a   :  { %v2186_v54 = vadd.f32 %v2185_v35, %v1911_v48  ;;  %v2262_v55 = vadd.f32 %v2261_v36, %v1977_v51 }
 0x17b   :  { %v2043_v56 = vadd.f32 %v2042_v37, %v1788_v52  ;;  %v2117_v57 = vadd.f32 %v2116_v38, %v1852_v53  ;;  %v3038_v37 = vld [vmem:[%s4040_s0 + $0xb8] sm:$0xff] }
 0x17c   :  { %v3070_v38 = vld [vmem:[%s4040_s0 + $0x1b8] sm:$0xff] }
 0x17d   :  { %v1498_v58 = vpop.f32.mrf.mxu2  ;;  %v1663_v59 = vpop.f32.mrf.mxu3 }
 0x17e   :  { %v1499_v0 = vadd.f32 %v3634_v41, %v1498_v58  ;;  %v1664_v1 = vadd.f32 %v3634_v41, %v1663_v59  ;;  %v1191_v2 = vpop.f32.mrf.mxu0  ;;  %v1351_v3 = vpop.f32.mrf.mxu1 }
 0x17f   :  { %v1192_v6 = vadd.f32 %v3634_v41, %v1191_v2  ;;  %v1352_v7 = vadd.f32 %v3634_v41, %v1351_v3 }
 0x180   :  { %v1912_v8 = vmax.f32 %v1499_v0, 0.0  ;;  %v1978_v9 = vmax.f32 %v1664_v1, 0.0 }
 0x181   :  { %v1789_v10 = vmax.f32 %v1192_v6, 0.0  ;;  %v1853_v12 = vmax.f32 %v1352_v7, 0.0  ;;  %1230 = vmatmul.bf16.gmra.mxu0 %v3037_v60  ;;  %1390 = vmatmul.bf16.gmra.mxu1 %v3069_v63 }
 0x182   :  { %v2187_v13 = vadd.f32 %v2186_v54, %v1912_v8  ;;  %v2263_v14 = vadd.f32 %v2262_v55, %v1978_v9  ;;  %1540 = vmatmul.bf16.gmra.mxu2 %v3099_v4  ;;  %1705 = vmatmul.bf16.gmra.mxu3 %v3132_v5 }
 0x183   :  { %v2044_v15 = vadd.f32 %v2043_v56, %v1789_v10  ;;  %v2118_v16 = vadd.f32 %v2117_v57, %v1853_v12 }
 0x185   :  { %v1501_v17 = vpop.f32.mrf.mxu2  ;;  %v1666_v18 = vpop.f32.mrf.mxu3 }
 0x186   :  { %v1502_v19 = vadd.f32 %v3634_v41, %v1501_v17  ;;  %v1667_v20 = vadd.f32 %v3634_v41, %v1666_v18  ;;  %v1193_v21 = vpop.f32.mrf.mxu0  ;;  %v1353_v23 = vpop.f32.mrf.mxu1 }
 0x187   :  { %v1194_v24 = vadd.f32 %v3634_v41, %v1193_v21  ;;  %v1354_v25 = vadd.f32 %v3634_v41, %v1353_v23  ;;  %v3101_v21 = vld [vmem:[%s4040_s0 + $0x2b0] sm:$0xff]  ;;  %v3134_v23 = vld [vmem:[%s4040_s0 + $0x3b8] sm:$0xff] }
 0x188   :  { %v1913_v26 = vmax.f32 %v1502_v19, 0.0  ;;  %v1979_v27 = vmax.f32 %v1667_v20, 0.0 }
 0x189   :  { %v1790_v28 = vmax.f32 %v1194_v24, 0.0  ;;  %v1854_v29 = vmax.f32 %v1354_v25, 0.0 }
 0x18a   :  { %v2188_v30 = vadd.f32 %v2187_v13, %v1913_v26  ;;  %v2264_v31 = vadd.f32 %v2263_v14, %v1979_v27 }
 0x18b   :  { %v2045_v32 = vadd.f32 %v2044_v15, %v1790_v28  ;;  %v2119_v33 = vadd.f32 %v2118_v16, %v1854_v29  ;;  %v3039_v15 = vld [vmem:[%s4040_s0 + $0xc0] sm:$0xff] }
 0x18c   :  { %v3071_v16 = vld [vmem:[%s4040_s0 + $0x1c0] sm:$0xff] }
 0x18d   :  { %v1503_v35 = vpop.f32.mrf.mxu2  ;;  %v1668_v36 = vpop.f32.mrf.mxu3 }
 0x18e   :  { %v1504_v39 = vadd.f32 %v3634_v41, %v1503_v35  ;;  %v1669_v40 = vadd.f32 %v3634_v41, %v1668_v36  ;;  %v1196_v46 = vpop.f32.mrf.mxu0  ;;  %v1356_v42 = vpop.f32.mrf.mxu1 }
 0x18f   :  { %v1197_v45 = vadd.f32 %v3634_v41, %v1196_v46  ;;  %v1357_v47 = vadd.f32 %v3634_v41, %v1356_v42 }
 0x190   :  { %v1914_v48 = vmax.f32 %v1504_v39, 0.0  ;;  %v1980_v51 = vmax.f32 %v1669_v40, 0.0 }
 0x191   :  { %v1791_v52 = vmax.f32 %v1197_v45, 0.0  ;;  %v1855_v53 = vmax.f32 %v1357_v47, 0.0  ;;  %1235 = vmatmul.bf16.gmra.mxu0 %v3038_v37  ;;  %1395 = vmatmul.bf16.gmra.mxu1 %v3070_v38 }
 0x192   :  { %v2189_v54 = vadd.f32 %v2188_v30, %v1914_v48  ;;  %v2265_v55 = vadd.f32 %v2264_v31, %v1980_v51  ;;  %1545 = vmatmul.bf16.gmra.mxu2 %v3100_v43  ;;  %1710 = vmatmul.bf16.gmra.mxu3 %v3133_v44 }
 0x193   :  { %v2046_v56 = vadd.f32 %v2045_v32, %v1791_v52  ;;  %v2120_v57 = vadd.f32 %v2119_v33, %v1855_v53  ;;  %v3040_v53 = vld [vmem:[%s4040_s0 + $0xc8] sm:$0xff] }
 0x195   :  { %v1506_v58 = vpop.f32.mrf.mxu2  ;;  %v1671_v59 = vpop.f32.mrf.mxu3 }
 0x196   :  { %v1507_v60 = vadd.f32 %v3634_v41, %v1506_v58  ;;  %v1672_v63 = vadd.f32 %v3634_v41, %v1671_v59  ;;  %v1198_v0 = vpop.f32.mrf.mxu0  ;;  %v1358_v1 = vpop.f32.mrf.mxu1  ;;  %v3102_v59 = vld [vmem:[%s4040_s0 + $0x2b8] sm:$0xff] }
 0x197   :  { %v1199_v2 = vadd.f32 %v3634_v41, %v1198_v0  ;;  %v1359_v3 = vadd.f32 %v3634_v41, %v1358_v1 }
 0x198   :  { %v1915_v4 = vmax.f32 %v1507_v60, 0.0  ;;  %v1981_v5 = vmax.f32 %v1672_v63, 0.0  ;;  %v3135_v60 = vld [vmem:[%s4040_s0 + $0x3c0] sm:$0xff] }
 0x199   :  { %v1792_v6 = vmax.f32 %v1199_v2, 0.0  ;;  %v1856_v7 = vmax.f32 %v1359_v3, 0.0 }
 0x19a   :  { %v2190_v8 = vadd.f32 %v2189_v54, %v1915_v4  ;;  %v2266_v9 = vadd.f32 %v2265_v55, %v1981_v5  ;;  %v3072_v54 = vld [vmem:[%s4040_s0 + $0x1c8] sm:$0xff] }
 0x19b   :  { %v3683_v10 = vadd.f32 %v2046_v56, %v1792_v6  ;;  %v3685_v12 = vadd.f32 %v2120_v57, %v1856_v7 }
 0x19d   :  { %v1508_v13 = vpop.f32.mrf.mxu2  ;;  %v1673_v14 = vpop.f32.mrf.mxu3 }
 0x19e   :  { %v1509_v17 = vadd.f32 %v3634_v41, %v1508_v13  ;;  %v1674_v18 = vadd.f32 %v3634_v41, %v1673_v14  ;;  %v1201_v19 = vpop.f32.mrf.mxu0  ;;  %v1361_v20 = vpop.f32.mrf.mxu1 }
 0x19f   :  { %v1202_v28 = vadd.f32 %v3634_v41, %v1201_v19  ;;  %v1362_v29 = vadd.f32 %v3634_v41, %v1361_v20 }
 0x1a0   :  { %v1916_v24 = vmax.f32 %v1509_v17, 0.0  ;;  %v1982_v25 = vmax.f32 %v1674_v18, 0.0 }
 0x1a1   :  { %1240 = vmatmul.bf16.gmra.mxu0 %v3039_v15  ;;  %1400 = vmatmul.bf16.gmra.mxu1 %v3071_v16  ;;  %v1793_v36 = vmax.f32 %v1202_v28, 0.0  ;;  %v1857_v37 = vmax.f32 %v1362_v29, 0.0  ;;  %v3041_v29 = vld [vmem:[%s4040_s0 + $0xd0] sm:$0xff] }
 0x1a2   :  { %v2191_v26 = vadd.f32 %v2190_v8, %v1916_v24  ;;  %v2267_v27 = vadd.f32 %v2266_v9, %v1982_v25  ;;  %1550 = vmatmul.bf16.gmra.mxu2 %v3101_v21  ;;  %1715 = vmatmul.bf16.gmra.mxu3 %v3134_v23 }
 0x1a5   :  { %v1511_v30 = vpop.f32.mrf.mxu2  ;;  %v1676_v31 = vpop.f32.mrf.mxu3 }
 0x1a6   :  { %v1512_v32 = vadd.f32 %v3634_v41, %v1511_v30  ;;  %v1677_v33 = vadd.f32 %v3634_v41, %v1676_v31  ;;  %v1203_v34 = vpop.f32.mrf.mxu0  ;;  %v1363_v35 = vpop.f32.mrf.mxu1  ;;  %v3073_v30 = vld [vmem:[%s4040_s0 + $0x1d0] sm:$0xff] }
 0x1a7   :  { %v1204_v38 = vadd.f32 %v3634_v41, %v1203_v34  ;;  %v1364_v39 = vadd.f32 %v3634_v41, %v1363_v35  ;;  %v3103_v35 = vld [vmem:[%s4040_s0 + $0x2c0] sm:$0xff] }
 0x1a8   :  { %v1917_v40 = vmax.f32 %v1512_v32, 0.0  ;;  %v1983_v46 = vmax.f32 %v1677_v33, 0.0 }
 0x1a9   :  { %v1794_v42 = vmax.f32 %v1204_v38, 0.0  ;;  %v1858_v43 = vmax.f32 %v1364_v39, 0.0 }
 0x1aa   :  { %v2192_v44 = vadd.f32 %v2191_v26, %v1917_v40  ;;  %v2268_v45 = vadd.f32 %v2267_v27, %v1983_v46 }
 0x1ab   :  { %v2054_v47 = vadd.f32 %v1794_v42, %v1793_v36  ;;  %v2128_v48 = vadd.f32 %v1858_v43, %v1857_v37  ;;  %v3136_v36 = vld [vmem:[%s4040_s0 + $0x3c8] sm:$0xff] }
 0x1ad   :  { %v1513_v51 = vpop.f32.mrf.mxu2  ;;  %v1678_v52 = vpop.f32.mrf.mxu3 }
 0x1ae   :  { %v1514_v55 = vadd.f32 %v3634_v41, %v1513_v51  ;;  %v1679_v56 = vadd.f32 %v3634_v41, %v1678_v52  ;;  %v1206_v57 = vpop.f32.mrf.mxu0  ;;  %v1366_v58 = vpop.f32.mrf.mxu1 }
 0x1af   :  { %v1207_v63 = vadd.f32 %v3634_v41, %v1206_v57  ;;  %v1367_v0 = vadd.f32 %v3634_v41, %v1366_v58 }
 0x1b0   :  { %v1918_v1 = vmax.f32 %v1514_v55, 0.0  ;;  %v1984_v2 = vmax.f32 %v1679_v56, 0.0 }
 0x1b1   :  { %v1795_v3 = vmax.f32 %v1207_v63, 0.0  ;;  %v1859_v4 = vmax.f32 %v1367_v0, 0.0  ;;  %1245 = vmatmul.bf16.gmra.mxu0 %v3040_v53  ;;  %1405 = vmatmul.bf16.gmra.mxu1 %v3072_v54 }
 0x1b2   :  { %v2193_v5 = vadd.f32 %v2192_v44, %v1918_v1  ;;  %v3723_v6 = vadd.f32 %v2268_v45, %v1984_v2  ;;  %1555 = vmatmul.bf16.gmra.mxu2 %v3102_v59  ;;  %1720 = vmatmul.bf16.gmra.mxu3 %v3135_v60 }
 0x1b3   :  { %v2055_v7 = vadd.f32 %v2054_v47, %v1795_v3  ;;  %v2129_v8 = vadd.f32 %v2128_v48, %v1859_v4  ;;  %v3154_v47 = vld [vmem:[%s4041_s3 + $0x18] sm:$0xff] }
 0x1b4   :  { %2425 = vmatpush.bf16.msrb.mxu1 %v3154_v47 }
 0x1b5   :  { %v1516_v9 = vpop.f32.mrf.mxu2  ;;  %v1681_v13 = vpop.f32.mrf.mxu3 }
 0x1b6   :  { %v1517_v14 = vadd.f32 %v3634_v41, %v1516_v9  ;;  %v1208_v15 = vpop.f32.mrf.mxu0  ;;  %v1368_v16 = vpop.f32.mrf.mxu1  ;;  %v1682_v26 = vadd.f32 %v3634_v41, %v1681_v13 }
 0x1b7   :  { %v1209_v17 = vadd.f32 %v3634_v41, %v1208_v15  ;;  %v1369_v18 = vadd.f32 %v3634_v41, %v1368_v16  ;;  %v3104_v15 = vld [vmem:[%s4040_s0 + $0x2c8] sm:$0xff]  ;;  %v3137_v16 = vld [vmem:[%s4040_s0 + $0x3d0] sm:$0xff] }
 0x1b8   :  { %v1919_v19 = vmax.f32 %v1517_v14, 0.0  ;;  %v1985_v39 = vmax.f32 %v1682_v26, 0.0 }
 0x1b9   :  { %v1796_v20 = vmax.f32 %v1209_v17, 0.0  ;;  %v1860_v21 = vmax.f32 %v1369_v18, 0.0 }
 0x1ba   :  { %v2194_v23 = vadd.f32 %v2193_v5, %v1919_v19  ;;  %v3042_v5 = vld [vmem:[%s4040_s0 + $0xd8] sm:$0xff] }
 0x1bb   :  { %v2056_v24 = vadd.f32 %v2055_v7, %v1796_v20  ;;  %v2130_v25 = vadd.f32 %v2129_v8, %v1860_v21  ;;  %v3074_v7 = vld [vmem:[%s4040_s0 + $0x1d8] sm:$0xff] }
 0x1bd   :  { %v1518_v27 = vpop.f32.mrf.mxu2  ;;  %v1683_v28 = vpop.f32.mrf.mxu3 }
 0x1be   :  { %v1519_v31 = vadd.f32 %v3634_v41, %v1518_v27  ;;  %v1684_v32 = vadd.f32 %v3634_v41, %v1683_v28  ;;  %v1211_v33 = vpop.f32.mrf.mxu0  ;;  %v1371_v34 = vpop.f32.mrf.mxu1 }
 0x1bf   :  { %v1212_v37 = vadd.f32 %v3634_v41, %v1211_v33  ;;  %v1372_v38 = vadd.f32 %v3634_v41, %v1371_v34 }
 0x1c0   :  { %v1920_v40 = vmax.f32 %v1519_v31, 0.0  ;;  %v1986_v46 = vmax.f32 %v1684_v32, 0.0 }
 0x1c1   :  { %v1797_v42 = vmax.f32 %v1212_v37, 0.0  ;;  %v1861_v43 = vmax.f32 %v1372_v38, 0.0  ;;  %1250 = vmatmul.bf16.gmra.mxu0 %v3041_v29  ;;  %1410 = vmatmul.bf16.gmra.mxu1 %v3073_v30 }
 0x1c2   :  { %v3745_v44 = vadd.f32 %v2194_v23, %v1920_v40  ;;  %v2276_v45 = vadd.f32 %v1986_v46, %v1985_v39  ;;  %1560 = vmatmul.bf16.gmra.mxu2 %v3103_v35  ;;  %1725 = vmatmul.bf16.gmra.mxu3 %v3136_v36 }
 0x1c3   :  { %v2057_v48 = vadd.f32 %v2056_v24, %v1797_v42  ;;  %v2131_v51 = vadd.f32 %v2130_v25, %v1861_v43 }
 0x1c5   :  { %v1521_v52 = vpop.f32.mrf.mxu2  ;;  %v1686_v53 = vpop.f32.mrf.mxu3 }
 0x1c6   :  { %v1687_v54 = vadd.f32 %v3634_v41, %v1686_v53  ;;  %v1213_v55 = vpop.f32.mrf.mxu0  ;;  %v1373_v56 = vpop.f32.mrf.mxu1  ;;  %v1522_v2 = vadd.f32 %v3634_v41, %v1521_v52  ;;  %v3043_v52 = vld [vmem:[%s4040_s0 + $0xe0] sm:$0xff] }
 0x1c7   :  { %v1214_v57 = vadd.f32 %v3634_v41, %v1213_v55  ;;  %v1374_v58 = vadd.f32 %v3634_v41, %v1373_v56  ;;  %v3075_v53 = vld [vmem:[%s4040_s0 + $0x1e0] sm:$0xff] }
 0x1c8   :  { %v1987_v59 = vmax.f32 %v1687_v54, 0.0  ;;  %v1921_v20 = vmax.f32 %v1522_v2, 0.0 }
 0x1c9   :  { %v1798_v60 = vmax.f32 %v1214_v57, 0.0  ;;  %v1862_v1 = vmax.f32 %v1374_v58, 0.0  ;;  %v3105_v58 = vld [vmem:[%s4040_s0 + $0x2d0] sm:$0xff] }
 0x1ca   :  { %v2277_v63 = vadd.f32 %v2276_v45, %v1987_v59  ;;  %v3138_v59 = vld [vmem:[%s4040_s0 + $0x3d8] sm:$0xff] }
 0x1cb   :  { %v2058_v0 = vadd.f32 %v2057_v48, %v1798_v60  ;;  %v2132_v17 = vadd.f32 %v2131_v51, %v1862_v1 }
 0x1cd   :  { %v1523_v3 = vpop.f32.mrf.mxu2  ;;  %v1688_v4 = vpop.f32.mrf.mxu3 }
 0x1ce   :  { %v1524_v8 = vadd.f32 %v3634_v41, %v1523_v3  ;;  %v1689_v9 = vadd.f32 %v3634_v41, %v1688_v4  ;;  %v1216_v13 = vpop.f32.mrf.mxu0  ;;  %v1376_v14 = vpop.f32.mrf.mxu1 }
 0x1cf   :  { %v1217_v18 = vadd.f32 %v3634_v41, %v1216_v13  ;;  %v1377_v19 = vadd.f32 %v3634_v41, %v1376_v14 }
 0x1d0   :  { %v1922_v21 = vmax.f32 %v1524_v8, 0.0  ;;  %v1988_v23 = vmax.f32 %v1689_v9, 0.0 }
 0x1d1   :  { %v1799_v24 = vmax.f32 %v1217_v18, 0.0  ;;  %v1863_v25 = vmax.f32 %v1377_v19, 0.0  ;;  %1255 = vmatmul.bf16.gmra.mxu0 %v3042_v5  ;;  %1415 = vmatmul.bf16.gmra.mxu1 %v3074_v7 }
 0x1d2   :  { %v2202_v26 = vadd.f32 %v1922_v21, %v1921_v20  ;;  %v2278_v27 = vadd.f32 %v2277_v63, %v1988_v23  ;;  %1565 = vmatmul.bf16.gmra.mxu2 %v3104_v15  ;;  %1730 = vmatmul.bf16.gmra.mxu3 %v3137_v16 }
 0x1d3   :  { %v2059_v28 = vadd.f32 %v2058_v0, %v1799_v24  ;;  %v2133_v29 = vadd.f32 %v2132_v17, %v1863_v25 }
 0x1d5   :  { %v1526_v30 = vpop.f32.mrf.mxu2  ;;  %v1691_v31 = vpop.f32.mrf.mxu3 }
 0x1d6   :  { %v1527_v32 = vadd.f32 %v3634_v41, %v1526_v30  ;;  %v1692_v33 = vadd.f32 %v3634_v41, %v1691_v31  ;;  %v1218_v34 = vpop.f32.mrf.mxu0  ;;  %v1378_v35 = vpop.f32.mrf.mxu1  ;;  %v3044_v31 = vld [vmem:[%s4040_s0 + $0xe8] sm:$0xff] }
 0x1d7   :  { %v1219_v36 = vadd.f32 %v3634_v41, %v1218_v34  ;;  %v1379_v37 = vadd.f32 %v3634_v41, %v1378_v35 }
 0x1d8   :  { %v1923_v38 = vmax.f32 %v1527_v32, 0.0  ;;  %v1989_v39 = vmax.f32 %v1692_v33, 0.0  ;;  %v3076_v32 = vld [vmem:[%s4040_s0 + $0x1e8] sm:$0xff] }
 0x1d9   :  { %v1800_v40 = vmax.f32 %v1219_v36, 0.0  ;;  %v1864_v46 = vmax.f32 %v1379_v37, 0.0  ;;  %v3106_v37 = vld [vmem:[%s4040_s0 + $0x2d8] sm:$0xff] }
 0x1da   :  { %v2203_v42 = vadd.f32 %v2202_v26, %v1923_v38  ;;  %v2279_v43 = vadd.f32 %v2278_v27, %v1989_v39  ;;  %v3139_v38 = vld [vmem:[%s4040_s0 + $0x3e0] sm:$0xff] }
 0x1db   :  { %v2060_v45 = vadd.f32 %v2059_v28, %v1800_v40  ;;  %v2134_v47 = vadd.f32 %v2133_v29, %v1864_v46 }
 0x1dd   :  { %v1528_v48 = vpop.f32.mrf.mxu2  ;;  %v1693_v51 = vpop.f32.mrf.mxu3 }
 0x1de   :  { %v1529_v54 = vadd.f32 %v3634_v41, %v1528_v48  ;;  %v1694_v55 = vadd.f32 %v3634_v41, %v1693_v51  ;;  %v1221_v56 = vpop.f32.mrf.mxu0  ;;  %v1381_v57 = vpop.f32.mrf.mxu1 }
 0x1df   :  { %v1222_v60 = vadd.f32 %v3634_v41, %v1221_v56  ;;  %v1382_v63 = vadd.f32 %v3634_v41, %v1381_v57 }
 0x1e0   :  { %v1924_v0 = vmax.f32 %v1529_v54, 0.0  ;;  %v1990_v1 = vmax.f32 %v1694_v55, 0.0 }
 0x1e1   :  { %v1801_v2 = vmax.f32 %v1222_v60, 0.0  ;;  %v1865_v3 = vmax.f32 %v1382_v63, 0.0  ;;  %1260 = vmatmul.bf16.gmra.mxu0 %v3043_v52  ;;  %1420 = vmatmul.bf16.gmra.mxu1 %v3075_v53 }
 0x1e2   :  { %v2204_v4 = vadd.f32 %v2203_v42, %v1924_v0  ;;  %v2280_v5 = vadd.f32 %v2279_v43, %v1990_v1  ;;  %1570 = vmatmul.bf16.gmra.mxu2 %v3105_v58  ;;  %1735 = vmatmul.bf16.gmra.mxu3 %v3138_v59 }
 0x1e3   :  { %v2061_v7 = vadd.f32 %v2060_v45, %v1801_v2  ;;  %v2135_v8 = vadd.f32 %v2134_v47, %v1865_v3 }
 0x1e5   :  { %v1531_v9 = vpop.f32.mrf.mxu2  ;;  %v1696_v13 = vpop.f32.mrf.mxu3 }
 0x1e6   :  { %v1532_v14 = vadd.f32 %v3634_v41, %v1531_v9  ;;  %v1697_v15 = vadd.f32 %v3634_v41, %v1696_v13  ;;  %v1223_v16 = vpop.f32.mrf.mxu0  ;;  %v1383_v17 = vpop.f32.mrf.mxu1 }
 0x1e7   :  { %v1224_v18 = vadd.f32 %v3634_v41, %v1223_v16  ;;  %v1384_v19 = vadd.f32 %v3634_v41, %v1383_v17 }
 0x1e8   :  { %v1925_v20 = vmax.f32 %v1532_v14, 0.0  ;;  %v1991_v21 = vmax.f32 %v1697_v15, 0.0  ;;  %v3045_v14 = vld [vmem:[%s4040_s0 + $0xf0] sm:$0xff] }
 0x1e9   :  { %v1802_v23 = vmax.f32 %v1224_v18, 0.0  ;;  %v1866_v24 = vmax.f32 %v1384_v19, 0.0  ;;  %v3107_v19 = vld [vmem:[%s4040_s0 + $0x2e0] sm:$0xff] }
 0x1ea   :  { %v2205_v25 = vadd.f32 %v2204_v4, %v1925_v20  ;;  %v2281_v26 = vadd.f32 %v2280_v5, %v1991_v21  ;;  %v3140_v20 = vld [vmem:[%s4040_s0 + $0x3e8] sm:$0xff] }
 0x1eb   :  { %v2062_v27 = vadd.f32 %v2061_v7, %v1802_v23  ;;  %v2136_v28 = vadd.f32 %v2135_v8, %v1866_v24  ;;  %v3153_v8 = vld [vmem:[%s4041_s3 + $0x10] sm:$0xff] }
 0x1ec   :  { %2426 = vmatpush.bf16.msrb.mxu1 %v3153_v8 }
 0x1ed   :  { %v1533_v29 = vpop.f32.mrf.mxu2  ;;  %v1698_v30 = vpop.f32.mrf.mxu3 }
 0x1ee   :  { %v1534_v33 = vadd.f32 %v3634_v41, %v1533_v29  ;;  %v1699_v34 = vadd.f32 %v3634_v41, %v1698_v30  ;;  %v1226_v35 = vpop.f32.mrf.mxu0  ;;  %v1386_v36 = vpop.f32.mrf.mxu1 }
 0x1ef   :  { %v1227_v39 = vadd.f32 %v3634_v41, %v1226_v35  ;;  %v1387_v40 = vadd.f32 %v3634_v41, %v1386_v36 }
 0x1f0   :  { %v1926_v46 = vmax.f32 %v1534_v33, 0.0  ;;  %v1992_v42 = vmax.f32 %v1699_v34, 0.0 }
 0x1f1   :  { %v1803_v43 = vmax.f32 %v1227_v39, 0.0  ;;  %v1867_v45 = vmax.f32 %v1387_v40, 0.0  ;;  %1265 = vmatmul.bf16.gmra.mxu0 %v3044_v31  ;;  %1425 = vmatmul.bf16.gmra.mxu1 %v3076_v32 }
 0x1f2   :  { %v2206_v47 = vadd.f32 %v2205_v25, %v1926_v46  ;;  %v2282_v48 = vadd.f32 %v2281_v26, %v1992_v42  ;;  %1575 = vmatmul.bf16.gmra.mxu2 %v3106_v37  ;;  %1740 = vmatmul.bf16.gmra.mxu3 %v3139_v38 }
 0x1f3   :  { %v2063_v51 = vadd.f32 %v2062_v27, %v1803_v43  ;;  %v2137_v52 = vadd.f32 %v2136_v28, %v1867_v45 }
 0x1f5   :  { %v1536_v53 = vpop.f32.mrf.mxu2  ;;  %v1701_v54 = vpop.f32.mrf.mxu3 }
 0x1f6   :  { %v1537_v55 = vadd.f32 %v3634_v41, %v1536_v53  ;;  %v1702_v56 = vadd.f32 %v3634_v41, %v1701_v54  ;;  %v1228_v57 = vpop.f32.mrf.mxu0  ;;  %v1388_v58 = vpop.f32.mrf.mxu1  ;;  %v3046_v54 = vld [vmem:[%s4040_s0 + $0xf8] sm:$0xff] }
 0x1f7   :  { %v1229_v59 = vadd.f32 %v3634_v41, %v1228_v57  ;;  %v1389_v60 = vadd.f32 %v3634_v41, %v1388_v58 }
 0x1f8   :  { %v1927_v63 = vmax.f32 %v1537_v55, 0.0  ;;  %v1993_v0 = vmax.f32 %v1702_v56, 0.0 }
 0x1f9   :  { %v1804_v1 = vmax.f32 %v1229_v59, 0.0  ;;  %v1868_v2 = vmax.f32 %v1389_v60, 0.0  ;;  %v3108_v59 = vld [vmem:[%s4040_s0 + $0x2e8] sm:$0xff]  ;;  %v3141_v60 = vld [vmem:[%s4040_s0 + $0x3f0] sm:$0xff] }
 0x1fa   :  { %v2207_v3 = vadd.f32 %v2206_v47, %v1927_v63  ;;  %v2283_v4 = vadd.f32 %v2282_v48, %v1993_v0 }
 0x1fb   :  { %v2064_v5 = vadd.f32 %v2063_v51, %v1804_v1  ;;  %v2138_v7 = vadd.f32 %v2137_v52, %v1868_v2 }
 0x1fd   :  { %v1538_v9 = vpop.f32.mrf.mxu2  ;;  %v1703_v13 = vpop.f32.mrf.mxu3 }
 0x1fe   :  { %v1539_v15 = vadd.f32 %v3634_v41, %v1538_v9  ;;  %v1704_v16 = vadd.f32 %v3634_v41, %v1703_v13  ;;  %v1231_v17 = vpop.f32.mrf.mxu0  ;;  %v1391_v18 = vpop.f32.mrf.mxu1 }
 0x1ff   :  { %v1232_v21 = vadd.f32 %v3634_v41, %v1231_v17  ;;  %v1392_v23 = vadd.f32 %v3634_v41, %v1391_v18 }
 0x200   :  { %v1928_v24 = vmax.f32 %v1539_v15, 0.0  ;;  %v1994_v25 = vmax.f32 %v1704_v16, 0.0 }
 0x201   :  { %v1805_v26 = vmax.f32 %v1232_v21, 0.0  ;;  %v1869_v27 = vmax.f32 %v1392_v23, 0.0  ;;  %1270 = vmatmul.bf16.gmra.mxu0 %v3045_v14 }
 0x202   :  { %v2208_v28 = vadd.f32 %v2207_v3, %v1928_v24  ;;  %v2284_v29 = vadd.f32 %v2283_v4, %v1994_v25  ;;  %1580 = vmatmul.bf16.gmra.mxu2 %v3107_v19  ;;  %1745 = vmatmul.bf16.gmra.mxu3 %v3140_v20 }
 0x203   :  { %v2065_v30 = vadd.f32 %v2064_v5, %v1805_v26  ;;  %v2139_v31 = vadd.f32 %v2138_v7, %v1869_v27 }
 0x205   :  { %v1541_v32 = vpop.f32.mrf.mxu2  ;;  %v1706_v33 = vpop.f32.mrf.mxu3 }
 0x206   :  { %v1542_v34 = vadd.f32 %v3634_v41, %v1541_v32  ;;  %v1707_v35 = vadd.f32 %v3634_v41, %v1706_v33  ;;  %v1233_v36 = vpop.f32.mrf.mxu0  ;;  %v1393_v37 = vpop.f32.mrf.mxu1 }
 0x207   :  { %v1234_v38 = vadd.f32 %v3634_v41, %v1233_v36  ;;  %v1394_v39 = vadd.f32 %v3634_v41, %v1393_v37  ;;  %v3109_v36 = vld [vmem:[%s4040_s0 + $0x2f0] sm:$0xff]  ;;  %v3142_v37 = vld [vmem:[%s4040_s0 + $0x3f8] sm:$0xff] }
 0x208   :  { %v1929_v40 = vmax.f32 %v1542_v34, 0.0  ;;  %v1995_v46 = vmax.f32 %v1707_v35, 0.0 }
 0x209   :  { %v1806_v42 = vmax.f32 %v1234_v38, 0.0  ;;  %v1870_v43 = vmax.f32 %v1394_v39, 0.0 }
 0x20a   :  { %v2209_v45 = vadd.f32 %v2208_v28, %v1929_v40  ;;  %v2285_v47 = vadd.f32 %v2284_v29, %v1995_v46 }
 0x20b   :  { %v2066_v48 = vadd.f32 %v2065_v30, %v1806_v42  ;;  %v2140_v51 = vadd.f32 %v2139_v31, %v1870_v43 }
 0x20d   :  { %v1543_v52 = vpop.f32.mrf.mxu2  ;;  %v1708_v53 = vpop.f32.mrf.mxu3 }
 0x20e   :  { %v1544_v55 = vadd.f32 %v3634_v41, %v1543_v52  ;;  %v1709_v56 = vadd.f32 %v3634_v41, %v1708_v53  ;;  %v1236_v57 = vpop.f32.mrf.mxu0  ;;  %v1396_v58 = vpop.f32.mrf.mxu1 }
 0x20f   :  { %v1237_v63 = vadd.f32 %v3634_v41, %v1236_v57  ;;  %v1397_v0 = vadd.f32 %v3634_v41, %v1396_v58 }
 0x210   :  { %v1930_v1 = vmax.f32 %v1544_v55, 0.0  ;;  %v1996_v2 = vmax.f32 %v1709_v56, 0.0 }
 0x211   :  { %v1807_v3 = vmax.f32 %v1237_v63, 0.0  ;;  %v1871_v4 = vmax.f32 %v1397_v0, 0.0  ;;  %1275 = vmatmul.bf16.gmra.mxu0 %v3046_v54 }
 0x212   :  { %v2210_v5 = vadd.f32 %v2209_v45, %v1930_v1  ;;  %v2286_v7 = vadd.f32 %v2285_v47, %v1996_v2  ;;  %1585 = vmatmul.bf16.gmra.mxu2 %v3108_v59  ;;  %1750 = vmatmul.bf16.gmra.mxu3 %v3141_v60 }
 0x213   :  { %v2067_v8 = vadd.f32 %v2066_v48, %v1807_v3  ;;  %v2141_v9 = vadd.f32 %v2140_v51, %v1871_v4 }
 0x215   :  { %v1546_v13 = vpop.f32.mrf.mxu2  ;;  %v1711_v14 = vpop.f32.mrf.mxu3 }
 0x216   :  { %v1547_v15 = vadd.f32 %v3634_v41, %v1546_v13  ;;  %v1712_v16 = vadd.f32 %v3634_v41, %v1711_v14  ;;  %v1238_v17 = vpop.f32.mrf.mxu0  ;;  %v1398_v18 = vpop.f32.mrf.mxu1 }
 0x217   :  { %v1239_v19 = vadd.f32 %v3634_v41, %v1238_v17  ;;  %v1399_v20 = vadd.f32 %v3634_v41, %v1398_v18 }
 0x218   :  { %v1931_v21 = vmax.f32 %v1547_v15, 0.0  ;;  %v1997_v23 = vmax.f32 %v1712_v16, 0.0 }
 0x219   :  { %v1808_v24 = vmax.f32 %v1239_v19, 0.0  ;;  %v1872_v25 = vmax.f32 %v1399_v20, 0.0 }
 0x21a   :  { %v2211_v26 = vadd.f32 %v2210_v5, %v1931_v21  ;;  %v2287_v27 = vadd.f32 %v2286_v7, %v1997_v23 }
 0x21b   :  { %v2068_v28 = vadd.f32 %v2067_v8, %v1808_v24  ;;  %v2142_v29 = vadd.f32 %v2141_v9, %v1872_v25 }
 0x21d   :  { %v1548_v30 = vpop.f32.mrf.mxu2  ;;  %v1713_v31 = vpop.f32.mrf.mxu3 }
 0x21e   :  { %v1549_v32 = vadd.f32 %v3634_v41, %v1548_v30  ;;  %v1714_v33 = vadd.f32 %v3634_v41, %v1713_v31  ;;  %v1241_v34 = vpop.f32.mrf.mxu0  ;;  %v1401_v35 = vpop.f32.mrf.mxu1 }
 0x21f   :  { %v1242_v38 = vadd.f32 %v3634_v41, %v1241_v34  ;;  %v1402_v39 = vadd.f32 %v3634_v41, %v1401_v35 }
 0x220   :  { %v1932_v40 = vmax.f32 %v1549_v32, 0.0  ;;  %v1998_v46 = vmax.f32 %v1714_v33, 0.0  ;;  %v3152_v33 = vld [vmem:[%s4041_s3 + $0x8] sm:$0xff] }
 0x221   :  { %v1809_v42 = vmax.f32 %v1242_v38, 0.0  ;;  %v1873_v43 = vmax.f32 %v1402_v39, 0.0  ;;  %2427 = vmatpush.bf16.msrb.mxu1 %v3152_v33 }
 0x222   :  { %v2212_v45 = vadd.f32 %v2211_v26, %v1932_v40  ;;  %v2288_v47 = vadd.f32 %v2287_v27, %v1998_v46  ;;  %1590 = vmatmul.bf16.gmra.mxu2 %v3109_v36  ;;  %1755 = vmatmul.bf16.gmra.mxu3 %v3142_v37 }
 0x223   :  { %v2069_v48 = vadd.f32 %v2068_v28, %v1809_v42  ;;  %v3861_v51 = vadd.f32 %v2142_v29, %v1873_v43 }
 0x225   :  { %v1551_v52 = vpop.f32.mrf.mxu2  ;;  %v1716_v53 = vpop.f32.mrf.mxu3 }
 0x226   :  { %v1552_v54 = vadd.f32 %v3634_v41, %v1551_v52  ;;  %v1717_v55 = vadd.f32 %v3634_v41, %v1716_v53  ;;  %v1243_v56 = vpop.f32.mrf.mxu0  ;;  %v3865_v57 = vpop.f32.mrf.mxu1 }
 0x227   :  { %v1244_v58 = vadd.f32 %v3634_v41, %v1243_v56 }
 0x228   :  { %v1933_v59 = vmax.f32 %v1552_v54, 0.0  ;;  %v1999_v60 = vmax.f32 %v1717_v55, 0.0 }
 0x229   :  { %v1810_v63 = vmax.f32 %v1244_v58, 0.0 }
 0x22a   :  { %v2213_v0 = vadd.f32 %v2212_v45, %v1933_v59  ;;  %v2289_v1 = vadd.f32 %v2288_v47, %v1999_v60 }
 0x22b   :  { %v2070_v2 = vadd.f32 %v2069_v48, %v1810_v63 }
 0x22d   :  { %v1553_v3 = vpop.f32.mrf.mxu2  ;;  %v1718_v4 = vpop.f32.mrf.mxu3 }
 0x22e   :  { %v1554_v5 = vadd.f32 %v3634_v41, %v1553_v3  ;;  %v1719_v7 = vadd.f32 %v3634_v41, %v1718_v4  ;;  %v1246_v8 = vpop.f32.mrf.mxu0  ;;  %v3870_v9 = vpop.f32.mrf.mxu1 }
 0x22f   :  { %v1247_v13 = vadd.f32 %v3634_v41, %v1246_v8 }
 0x230   :  { %v1934_v14 = vmax.f32 %v1554_v5, 0.0  ;;  %v2000_v15 = vmax.f32 %v1719_v7, 0.0 }
 0x231   :  { %v1811_v16 = vmax.f32 %v1247_v13, 0.0 }
 0x232   :  { %v2214_v17 = vadd.f32 %v2213_v0, %v1934_v14  ;;  %v2290_v18 = vadd.f32 %v2289_v1, %v2000_v15 }
 0x233   :  { %v2071_v19 = vadd.f32 %v2070_v2, %v1811_v16 }
 0x235   :  { %v1556_v20 = vpop.f32.mrf.mxu2  ;;  %v1721_v21 = vpop.f32.mrf.mxu3 }
 0x236   :  { %v1557_v23 = vadd.f32 %v3634_v41, %v1556_v20  ;;  %v1722_v24 = vadd.f32 %v3634_v41, %v1721_v21  ;;  %v1248_v25 = vpop.f32.mrf.mxu0  ;;  %v1408_v26 = vpop.f32.mrf.mxu1 }
 0x237   :  { %v1249_v27 = vadd.f32 %v3634_v41, %v1248_v25 }
 0x238   :  { %v1935_v28 = vmax.f32 %v1557_v23, 0.0  ;;  %v2001_v29 = vmax.f32 %v1722_v24, 0.0 }
 0x239   :  { %v1812_v30 = vmax.f32 %v1249_v27, 0.0 }
 0x23a   :  { %v2215_v31 = vadd.f32 %v2214_v17, %v1935_v28  ;;  %v2291_v32 = vadd.f32 %v2290_v18, %v2001_v29 }
 0x23b   :  { %v2072_v34 = vadd.f32 %v2071_v19, %v1812_v30 }
 0x23d   :  { %v1558_v35 = vpop.f32.mrf.mxu2  ;;  %v1723_v36 = vpop.f32.mrf.mxu3 }
 0x23e   :  { %v1559_v37 = vadd.f32 %v3634_v41, %v1558_v35  ;;  %v1724_v38 = vadd.f32 %v3634_v41, %v1723_v36  ;;  %v1251_v39 = vpop.f32.mrf.mxu0  ;;  %v1411_v40 = vpop.f32.mrf.mxu1 }
 0x23f   :  { %v1252_v46 = vadd.f32 %v3634_v41, %v1251_v39 }
 0x240   :  { %v1936_v42 = vmax.f32 %v1559_v37, 0.0  ;;  %v2002_v43 = vmax.f32 %v1724_v38, 0.0 }
 0x241   :  { %v1813_v45 = vmax.f32 %v1252_v46, 0.0 }
 0x242   :  { %v2216_v47 = vadd.f32 %v2215_v31, %v1936_v42  ;;  %v2292_v48 = vadd.f32 %v2291_v32, %v2002_v43 }
 0x243   :  { %v3882_v52 = vadd.f32 %v2072_v34, %v1813_v45 }
 0x245   :  { %v1561_v53 = vpop.f32.mrf.mxu2  ;;  %v1726_v54 = vpop.f32.mrf.mxu3 }
 0x246   :  { %v1562_v55 = vadd.f32 %v3634_v41, %v1561_v53  ;;  %v1727_v56 = vadd.f32 %v3634_v41, %v1726_v54  ;;  %v3886_v58 = vpop.f32.mrf.mxu0  ;;  %v1413_v59 = vpop.f32.mrf.mxu1 }
 0x248   :  { %v1937_v60 = vmax.f32 %v1562_v55, 0.0  ;;  %v2003_v63 = vmax.f32 %v1727_v56, 0.0 }
 0x24a   :  { %v2217_v0 = vadd.f32 %v2216_v47, %v1937_v60  ;;  %v2293_v1 = vadd.f32 %v2292_v48, %v2003_v63 }
 0x24d   :  { %v1563_v2 = vpop.f32.mrf.mxu2  ;;  %v1728_v3 = vpop.f32.mrf.mxu3 }
 0x24e   :  { %v1564_v4 = vadd.f32 %v3634_v41, %v1563_v2  ;;  %v1729_v5 = vadd.f32 %v3634_v41, %v1728_v3  ;;  %v3890_v7 = vpop.f32.mrf.mxu0  ;;  %v1416_v8 = vpop.f32.mrf.mxu1 }
 0x250   :  { %v1938_v13 = vmax.f32 %v1564_v4, 0.0  ;;  %v2004_v14 = vmax.f32 %v1729_v5, 0.0 }
 0x252   :  { %v2218_v15 = vadd.f32 %v2217_v0, %v1938_v13  ;;  %v2294_v16 = vadd.f32 %v2293_v1, %v2004_v14 }
 0x255   :  { %v1566_v17 = vpop.f32.mrf.mxu2  ;;  %v1731_v18 = vpop.f32.mrf.mxu3 }
 0x256   :  { %v1567_v19 = vadd.f32 %v3634_v41, %v1566_v17  ;;  %v1732_v20 = vadd.f32 %v3634_v41, %v1731_v18  ;;  %v3894_v21 = vpop.f32.mrf.mxu0  ;;  %v1418_v23 = vpop.f32.mrf.mxu1  ;;  %v3909_v41 = vld [vmem:[%s4039_s2] ss:$0 sm:$0xff] }
 0x257   :  { %v1404_v33 = vadd.f32 %v3909_v41, %v3865_v57  ;;  %v1407_v34 = vadd.f32 %v3909_v41, %v3870_v9  ;;  %v1409_v36 = vadd.f32 %v3909_v41, %v1408_v26  ;;  %v1412_v38 = vadd.f32 %v3909_v41, %v1411_v40 }
 0x258   :  { %v1939_v24 = vmax.f32 %v1567_v19, 0.0  ;;  %v2005_v25 = vmax.f32 %v1732_v20, 0.0  ;;  %v1414_v57 = vadd.f32 %v3909_v41, %v1413_v59  ;;  %v1417_v53 = vadd.f32 %v3909_v41, %v1416_v8 }
 0x259   :  { %v1874_v35 = vmax.f32 %v1404_v33, 0.0  ;;  %v1875_v37 = vmax.f32 %v1407_v34, 0.0  ;;  %v1876_v47 = vmax.f32 %v1409_v36, 0.0  ;;  %v1877_v9 = vmax.f32 %v1412_v38, 0.0 }
 0x25a   :  { %v3896_v27 = vadd.f32 %v2218_v15, %v1939_v24  ;;  %v3898_v28 = vadd.f32 %v2294_v16, %v2005_v25  ;;  %v1878_v54 = vmax.f32 %v1414_v57, 0.0  ;;  %v1419_v40 = vadd.f32 %v3909_v41, %v1418_v23  ;;  %v3151_v15 = vld [vmem:[%s4041_s3] sm:$0xff] }
 0x25b   :  { %v2144_v45 = vadd.f32 %v3861_v51, %v1874_v35  ;;  %v1879_v56 = vmax.f32 %v1417_v53, 0.0  ;;  %2428 = vmatpush.bf16.msrb.mxu1 %v3151_v15  ;;  %v1432_v24 = vadd.f32 %v3909_v41, %v3356_v49  ;;  %v1434_v33 = vadd.f32 %v3909_v41, %v3362_v61 }
 0x25c   :  { %v1880_v59 = vmax.f32 %v1419_v40, 0.0  ;;  %v1254_v61 = vadd.f32 %v3909_v41, %v3886_v58  ;;  %v2048_v40 = vrot.slane %v3683_v10, 4 }
 0x25d   :  { %v3900_v29 = vpop.f32.mrf.mxu2  ;;  %v3902_v30 = vpop.f32.mrf.mxu3  ;;  %v2145_v48 = vadd.f32 %v2144_v45, %v1875_v37  ;;  %v1885_v36 = vmax.f32 %v1432_v24, 0.0  ;;  %v1437_v37 = vadd.f32 %v3909_v41, %v3380_v11  ;;  %v1439_v45 = vadd.f32 %v3909_v41, %v3385_v22 }
 0x25e   :  { %v3904_v31 = vpop.f32.mrf.mxu0  ;;  %v1421_v32 = vpop.f32.mrf.mxu1  ;;  %v1257_v11 = vadd.f32 %v3909_v41, %v3890_v7  ;;  %v1259_v22 = vadd.f32 %v3909_v41, %v3894_v21  ;;  %v2049_v7 = vadd.f32 %v2048_v40, %v3683_v10 }
 0x25f   :  { %v2146_v26 = vadd.f32 %v2145_v48, %v1876_v47  ;;  %v1422_v60 = vadd.f32 %v3909_v41, %v1421_v32 }
 0x261   :  { %v2147_v55 = vadd.f32 %v2146_v26, %v1877_v9  ;;  %v1881_v5 = vmax.f32 %v1422_v60, 0.0  ;;  %v1887_v9 = vmax.f32 %v1437_v37, 0.0  ;;  %v1888_v26 = vmax.f32 %v1439_v45, 0.0 }
 0x262   :  { %v2122_v60 = vrot.slane %v3685_v12, 4 }
 0x263   :  { %v2148_v2 = vadd.f32 %v2147_v55, %v1878_v54  ;;  %v1814_v55 = vmax.f32 %v1254_v61, 0.0 }
 0x265   :  { %v3917_v39 = vpop.f32.mrf.mxu2  ;;  %v3919_v46 = vpop.f32.mrf.mxu3  ;;  %v2149_v4 = vadd.f32 %v2148_v2, %v1879_v56  ;;  %v1262_v2 = vadd.f32 %v3909_v41, %v3904_v31  ;;  %v2050_v31 = vrot.slane %v2049_v7, 2 }
 0x266   :  { %v3921_v42 = vpop.f32.mrf.mxu0  ;;  %v1423_v43 = vpop.f32.mrf.mxu1 }
 0x267   :  { %v1424_v3 = vadd.f32 %v3909_v41, %v1423_v43  ;;  %v2150_v13 = vadd.f32 %v2149_v4, %v1880_v59  ;;  %v1886_v43 = vmax.f32 %v1434_v33, 0.0  ;;  %v2074_v4 = vadd.f32 %v3882_v52, %v1814_v55 }
 0x268   :  { %v1264_v21 = vadd.f32 %v3909_v41, %v3921_v42  ;;  %v2051_v42 = vadd.f32 %v2050_v31, %v2049_v7 }
 0x269   :  { %v1882_v14 = vmax.f32 %v1424_v3, 0.0  ;;  %v2151_v16 = vadd.f32 %v2150_v13, %v1881_v5  ;;  %v1816_v5 = vmax.f32 %v1259_v22, 0.0 }
 0x26b   :  { %v2152_v25 = vadd.f32 %v2151_v16, %v1882_v14  ;;  %v1817_v14 = vmax.f32 %v1262_v2, 0.0  ;;  %v1572_v2 = vadd.f32 %v3909_v41, %v3917_v39  ;;  %v3997_v39 = vadd.f32 %v3909_v41, %v3358_v50 }
 0x26d   :  { %v3928_v63 = vpop.f32.mrf.mxu2  ;;  %v3930_v0 = vpop.f32.mrf.mxu3 }
 0x26e   :  { %v1266_v51 = vpop.f32.mrf.mxu0  ;;  %v1426_v1 = vpop.f32.mrf.mxu1 }
 0x26f   :  { %v1427_v8 = vadd.f32 %v3909_v41, %v1426_v1  ;;  %v1815_v1 = vmax.f32 %v1257_v11, 0.0  ;;  %v1267_v15 = vadd.f32 %v3909_v41, %v1266_v51  ;;  %v1734_v11 = vadd.f32 %v3909_v41, %v3902_v30 }
 0x270   :  { %v1574_v30 = vadd.f32 %v3909_v41, %v3928_v63 }
 0x271   :  { %v1883_v17 = vmax.f32 %v1427_v8, 0.0  ;;  %v2123_v8 = vadd.f32 %v2122_v60, %v3685_v12  ;;  %v2075_v13 = vadd.f32 %v2074_v4, %v1815_v1 }
 0x273   :  { %v2153_v34 = vadd.f32 %v2152_v25, %v1883_v17  ;;  %v2076_v16 = vadd.f32 %v2075_v13, %v1816_v5  ;;  %v1818_v17 = vmax.f32 %v1264_v21, 0.0  ;;  %v2124_v24 = vrot.slane %v2123_v8, 2 }
 0x274   :  { %v1819_v25 = vmax.f32 %v1267_v15, 0.0  ;;  %v1941_v15 = vmax.f32 %v1572_v2, 0.0 }
 0x275   :  { %v3937_v18 = vpop.f32.mrf.mxu2  ;;  %v3939_v19 = vpop.f32.mrf.mxu3  ;;  %v2077_v10 = vadd.f32 %v2076_v16, %v1817_v14  ;;  %v2125_v37 = vadd.f32 %v2124_v24, %v2123_v8 }
 0x276   :  { %v1268_v20 = vpop.f32.mrf.mxu0  ;;  %v1428_v23 = vpop.f32.mrf.mxu1  ;;  %v1577_v31 = vadd.f32 %v3909_v41, %v3937_v18 }
 0x277   :  { %v1429_v32 = vadd.f32 %v3909_v41, %v1428_v23  ;;  %v1269_v23 = vadd.f32 %v3909_v41, %v1268_v20 }
 0x279   :  { %v1884_v35 = vmax.f32 %v1429_v32, 0.0  ;;  %v1820_v51 = vmax.f32 %v1269_v23, 0.0 }
 0x27b   :  { %v2154_v38 = vadd.f32 %v2153_v34, %v1884_v35  ;;  %v2196_v34 = vrot.slane %v3745_v44, 4  ;;  %v2078_v35 = vadd.f32 %v2077_v10, %v1818_v17  ;;  %v1942_v10 = vmax.f32 %v1574_v30, 0.0 }
 0x27d   :  { %v2155_v47 = vadd.f32 %v2154_v38, %v1885_v36  ;;  %v3950_v57 = vpop.f32.mrf.mxu2  ;;  %v3952_v49 = vpop.f32.mrf.mxu3  ;;  %v2079_v38 = vadd.f32 %v2078_v35, %v1819_v25  ;;  %v1742_v25 = vadd.f32 %v3909_v41, %v3939_v19 }
 0x27e   :  { %v1271_v48 = vpop.f32.mrf.mxu0  ;;  %v1579_v50 = vadd.f32 %v3909_v41, %v3950_v57 }
 0x27f   :  { %v2156_v53 = vadd.f32 %v2155_v47, %v1886_v43  ;;  %v1272_v52 = vadd.f32 %v3909_v41, %v1271_v48  ;;  %v2052_v47 = vrot.slane %v2051_v42, 1  ;;  %v2197_v48 = vadd.f32 %v2196_v34, %v3745_v44 }
 0x281   :  { %v2157_v54 = vadd.f32 %v2156_v53, %v1887_v9  ;;  %v1821_v43 = vmax.f32 %v1272_v52, 0.0  ;;  %v2080_v9 = vadd.f32 %v2079_v38, %v1820_v51  ;;  %v2126_v53 = vrot.slane %v2125_v37, 1 }
 0x282   :  { %v2053_v1 = vadd.f32 %v2052_v47, %v2051_v42  ;;  %v2198_v44 = vrot.slane %v2197_v48, 2 }
 0x283   :  { %v2158_v56 = vadd.f32 %v2157_v54, %v1888_v26  ;;  %v1569_v26 = vadd.f32 %v3909_v41, %v3900_v29  ;;  %v2081_v40 = vadd.f32 %v2080_v9, %v1821_v43  ;;  %v2127_v5 = vadd.f32 %v2126_v53, %v2125_v37 }
 0x284   :  { %v2313_v16 = vpack.c.bf16 %v2053_v1, %v2053_v1  ;;  %v2199_v17 = vadd.f32 %v2198_v44, %v2197_v48  ;;  %v2009_v43 = vmax.f32 %v1742_v25, 0.0 }
 0x285   :  { %v3964_v58 = vpop.f32.mrf.mxu2  ;;  %v3966_v59 = vpop.f32.mrf.mxu3  ;;  %v2159_v20 = vrot.slane %v2158_v56, 4  ;;  %v1940_v21 = vmax.f32 %v1569_v26, 0.0  ;;  %v2315_v52 = vpack.c.bf16 %v2127_v5, %v2127_v5 }
 0x286   :  { %v1273_v3 = vpop.f32.mrf.mxu0  ;;  %v2200_v37 = vrot.slane %v2199_v17, 1  ;;  %v1582_v19 = vadd.f32 %v3909_v41, %v3964_v58  ;;  %v2349_v47 = vunpack.c.l.b16 %v2313_v16 }
 0x287   :  { %v1274_v36 = vadd.f32 %v3909_v41, %v1273_v3  ;;  %v2160_v54 = vadd.f32 %v2159_v20, %v2158_v56  ;;  %v1737_v3 = vadd.f32 %v3909_v41, %v3919_v46  ;;  %v2006_v56 = vmax.f32 %v1734_v11, 0.0 }
 0x288   :  { %v1739_v46 = vadd.f32 %v3909_v41, %v3930_v0  ;;  %v2220_v63 = vadd.f32 %v3896_v27, %v1940_v21  ;;  %v1744_v27 = vadd.f32 %v3909_v41, %v3952_v49  ;;  %v2201_v58 = vadd.f32 %v2200_v37, %v2199_v17 }
 0x289   :  { %v1822_v61 = vmax.f32 %v1274_v36, 0.0  ;;  %v2161_v8 = vrot.slane %v2160_v54, 2  ;;  %v2007_v23 = vmax.f32 %v1737_v3, 0.0  ;;  %v2296_v42 = vadd.f32 %v3898_v28, %v2006_v56 }
 0x28a   :  { %v2221_v35 = vadd.f32 %v2220_v63, %v1941_v15  ;;  %v2008_v51 = vmax.f32 %v1739_v46, 0.0  ;;  %v1943_v36 = vmax.f32 %v1577_v31, 0.0  ;;  %v1747_v28 = vadd.f32 %v3909_v41, %v3966_v59 }
 0x28b   :  { %v2082_v4 = vadd.f32 %v2081_v40, %v1822_v61  ;;  %v2162_v0 = vadd.f32 %v2161_v8, %v2160_v54  ;;  %v2297_v38 = vadd.f32 %v2296_v42, %v2007_v23  ;;  %v2010_v26 = vmax.f32 %v1744_v27, 0.0 }
 0x28c   :  { %v2222_v57 = vadd.f32 %v2221_v35, %v1942_v10  ;;  %v1945_v54 = vmax.f32 %v1582_v19, 0.0  ;;  %v2011_v59 = vmax.f32 %v1747_v28, 0.0  ;;  %v2351_v21 = vunpack.c.l.b16 %v2315_v52 }
 0x28d   :  { %v3976_v32 = vpop.f32.mrf.mxu2  ;;  %v3978_v33 = vpop.f32.mrf.mxu3  ;;  %v2163_v48 = vrot.slane %v2162_v0, 1  ;;  %v2298_v53 = vadd.f32 %v2297_v38, %v2008_v51  ;;  %v2317_v15 = vpack.c.bf16 %v2201_v58, %v2201_v58  ;;  %v2270_v63 = vrot.slane %v3723_v6, 4 }
 0x28e   :  { %v1276_v12 = vpop.f32.mrf.mxu0  ;;  %v1584_v9 = vadd.f32 %v3909_v41, %v3976_v32  ;;  %v2223_v49 = vadd.f32 %v2222_v57, %v1943_v36  ;;  %v1749_v11 = vadd.f32 %v3909_v41, %v3978_v33  ;;  %v1599_v57 = vadd.f32 %v3909_v41, %v3364_v62 }
 0x28f   :  { %v1277_v45 = vadd.f32 %v3909_v41, %v1276_v12  ;;  %v2299_v1 = vadd.f32 %v2298_v53, %v2009_v43  ;;  %v2164_v44 = vadd.f32 %v2163_v48, %v2162_v0  ;;  %v2353_v0 = vunpack.c.l.b16 %v2317_v15 }
 0x290   :  { %v1946_v3 = vmax.f32 %v1584_v9, 0.0  ;;  %v2012_v33 = vmax.f32 %v1749_v11, 0.0  ;;  %v2271_v43 = vadd.f32 %v2270_v63, %v3723_v6  ;;  %v1951_v53 = vmax.f32 %v3997_v39, 0.0 }
 0x291   :  { %v1823_v55 = vmax.f32 %v1277_v45, 0.0  ;;  %v1944_v45 = vmax.f32 %v1579_v50, 0.0  ;;  %v2300_v30 = vadd.f32 %v2299_v1, %v2010_v26  ;;  %v2316_v16 = vpack.c.bf16 %v2164_v44, %v2164_v44 }
 0x292   :  { %v2272_v11 = vrot.slane %v2271_v43, 2  ;;  %v1952_v58 = vmax.f32 %v1599_v57, 0.0 }
 0x293   :  { %v2083_v13 = vadd.f32 %v2082_v4, %v1823_v55  ;;  %v2224_v2 = vadd.f32 %v2223_v49, %v1944_v45  ;;  %v2301_v46 = vadd.f32 %v2300_v30, %v2011_v59 }
 0x295   :  { %v1586_v22 = vpop.f32.mrf.mxu2  ;;  %v1751_v60 = vpop.f32.mrf.mxu3  ;;  %v2225_v8 = vadd.f32 %v2224_v2, %v1945_v54  ;;  %v2302_v10 = vadd.f32 %v2301_v46, %v2012_v33  ;;  %v2273_v2 = vadd.f32 %v2272_v11, %v2271_v43 }
 0x296   :  { %v1278_v7 = vpop.f32.mrf.mxu0  ;;  %v1587_v40 = vadd.f32 %v3909_v41, %v1586_v22 }
 0x297   :  { %v1279_v29 = vadd.f32 %v3909_v41, %v1278_v7  ;;  %v1752_v7 = vadd.f32 %v3909_v41, %v1751_v60  ;;  %v2226_v17 = vadd.f32 %v2225_v8, %v1946_v3 }
 0x298   :  { %v1947_v22 = vmax.f32 %v1587_v40, 0.0 }
 0x299   :  { %v1824_v14 = vmax.f32 %v1279_v29, 0.0  ;;  %v2013_v60 = vmax.f32 %v1752_v7, 0.0  ;;  %v2274_v7 = vrot.slane %v2273_v2, 1 }
 0x29a   :  { %v2227_v50 = vadd.f32 %v2226_v17, %v1947_v22 }
 0x29b   :  { %v2084_v24 = vadd.f32 %v2083_v13, %v1824_v14 }
 0x29d   :  { %v2085_v12 = vrot.slane %v2084_v24, 4  ;;  %v1588_v34 = vpop.f32.mrf.mxu2  ;;  %v1753_v18 = vpop.f32.mrf.mxu3 }
 0x29e   :  { %v1589_v4 = vadd.f32 %v3909_v41, %v1588_v34  ;;  %v1754_v56 = vadd.f32 %v3909_v41, %v1753_v18  ;;  %v2352_v18 = vunpack.c.l.b16 %v2316_v16 }
 0x29f   :  { %v2086_v20 = vadd.f32 %v2085_v12, %v2084_v24  ;;  %v2303_v12 = vadd.f32 %v2302_v10, %v2013_v60  ;;  %v3184_v60 = vld [vmem:[%s4042_s4] ss:$0 sm:$0xff] }
 0x2a0   :  { %v1948_v24 = vmax.f32 %v1589_v4, 0.0  ;;  %v2014_v25 = vmax.f32 %v1754_v56, 0.0  ;;  %v2275_v4 = vadd.f32 %v2274_v7, %v2273_v2 }
 0x2a1   :  { %v2087_v61 = vrot.slane %v2086_v20, 2 }
 0x2a2   :  { %v2228_v51 = vadd.f32 %v2227_v50, %v1948_v24  ;;  %v2304_v38 = vadd.f32 %v2303_v12, %v2014_v25 }
 0x2a3   :  { %v2088_v55 = vadd.f32 %v2087_v61, %v2086_v20 }
 0x2a5   :  { %v2089_v32 = vrot.slane %v2088_v55, 1  ;;  %v1591_v29 = vpop.f32.mrf.mxu2  ;;  %v1756_v5 = vpop.f32.mrf.mxu3 }
 0x2a6   :  { %v1592_v14 = vadd.f32 %v3909_v41, %v1591_v29  ;;  %v1757_v31 = vadd.f32 %v3909_v41, %v1756_v5 }
 0x2a7   :  { %v2090_v13 = vadd.f32 %v2089_v32, %v2088_v55 }
 0x2a8   :  { %v1949_v42 = vmax.f32 %v1592_v14, 0.0  ;;  %v2015_v34 = vmax.f32 %v1757_v31, 0.0 }
 0x2a9   :  { %v2314_v23 = vpack.c.bf16 %v2090_v13, %v2090_v13 }
 0x2aa   :  { %v2229_v45 = vadd.f32 %v2228_v51, %v1949_v42  ;;  %v2305_v48 = vadd.f32 %v2304_v38, %v2015_v34 }
 0x2ab   :  { %v2350_v52 = vunpack.c.l.b16 %v2314_v23 }
 0x2ad   :  { %v2358_v35 = vsel %vm2357_vm0, %v2350_v52, %v2349_v47  ;;  %v1593_v36 = vpop.f32.mrf.mxu2  ;;  %v1758_v27 = vpop.f32.mrf.mxu3 }
 0x2ae   :  { %v2360_v37 = vsel %vm2359_vm1, %v2351_v21, %v2358_v35  ;;  %v1594_v19 = vadd.f32 %v3909_v41, %v1593_v36  ;;  %v1759_v20 = vadd.f32 %v3909_v41, %v1758_v27  ;;  %v2319_v21 = vpack.c.bf16 %v2275_v4, %v2275_v4 }
 0x2af   :  { %v2362_v28 = vsel %vm2361_vm2, %v2352_v18, %v2360_v37 }
 0x2b0   :  { %v1950_v9 = vmax.f32 %v1594_v19, 0.0  ;;  %v2016_v47 = vmax.f32 %v1759_v20, 0.0  ;;  %v2364_v61 = vsel %vm2363_vm3, %v2353_v0, %v2362_v28  ;;  %v2355_v8 = vunpack.c.l.b16 %v2319_v21 }
 0x2b2   :  { %v2230_v49 = vadd.f32 %v2229_v45, %v1950_v9  ;;  %v2306_v26 = vadd.f32 %v2305_v48, %v2016_v47 }
 0x2b4   :  { %v2231_v54 = vadd.f32 %v2230_v49, %v1951_v53  ;;  %v2307_v40 = vrot.slane %v2306_v26, 4 }
 0x2b6   :  { %v2232_v55 = vadd.f32 %v2231_v54, %v1952_v58  ;;  %v2308_v1 = vadd.f32 %v2307_v40, %v2306_v26 }
 0x2b8   :  { %v2233_v62 = vrot.slane %v2232_v55, 4  ;;  %v2309_v41 = vrot.slane %v2308_v1, 2 }
 0x2ba   :  { %v2234_v6 = vadd.f32 %v2233_v62, %v2232_v55  ;;  %v2310_v59 = vadd.f32 %v2309_v41, %v2308_v1 }
 0x2bc   :  { %v2235_v44 = vrot.slane %v2234_v6, 2  ;;  %v2311_v3 = vrot.slane %v2310_v59, 1 }
 0x2be   :  { %v2236_v32 = vadd.f32 %v2235_v44, %v2234_v6  ;;  %v2312_v39 = vadd.f32 %v2311_v3, %v2310_v59 }
 0x2c0   :  { %v2237_v29 = vrot.slane %v2236_v32, 1  ;;  %v2320_v33 = vpack.c.bf16 %v2312_v39, %v2312_v39 }
 0x2c2   :  { %v2238_v5 = vadd.f32 %v2237_v29, %v2236_v32  ;;  %v2356_v22 = vunpack.c.l.b16 %v2320_v33 }
 0x2c4   :  { %v2318_v30 = vpack.c.bf16 %v2238_v5, %v2238_v5 }
 0x2c6   :  { %v2354_v56 = vunpack.c.l.b16 %v2318_v30 }
 0x2c8   :  { %v2366_v13 = vsel %vm2365_vm4, %v2354_v56, %v2364_v61 }
 0x2c9   :  { %v2368_v14 = vsel %vm2367_vm5, %v2355_v8, %v2366_v13 }
 0x2ca   :  { %v2370_v15 = vsel %vm2369_vm6, %v2356_v22, %v2368_v14 }
 0x2cb   :  { %v2371_v46 = vpack.c.b16 %v2370_v15, %v2370_v15 }
 0x2cd   :  { %2429 = vmatmul.bf16.vlgmr.msrb.gmra.mxu1 %v2371_v46 }
 0x34a   :  { %v2430_v31 = vpop.f32.mrf.mxu1 }
 0x34b   :  { %v2431_v16 = vadd.f32 %v3184_v60, %v2430_v31 }
 0x34d   :  { %2434 = vst [vmem:[%s4043_s5] sm:$0xff] %v2431_v16 }
 0x352   :  { %v2432_v17 = vpop.f32.mrf.mxu1 }

</bundles_post_ra>
